<compile_context>
chip_gen: v7x
topology: tpu7x:2x2x1
jax: 0.10.0
libtpu: 0.0.40
codegen_flags: <defaults>
</compile_context>

<pallas_src>
import functools

import numpy as np
import jax
import jax.numpy as jnp
from jax.experimental import pallas as pl
from jax.experimental.pallas import tpu as pltpu


def _round_up(x, m):
    return ((x + m - 1) // m) * m


def _pick_ent_tile(e_pad, tile_max):
    """Largest multiple-of-128 divisor of e_pad that is <= tile_max."""
    m = e_pad // 128
    best = 1
    for t in range(1, m + 1):
        if m % t == 0 and 128 * t <= tile_max:
            best = t
    return 128 * best


def _xavier_normal(key, shape):
    fan_out, fan_in = shape[0], shape[1]
    std = (2.0 / (fan_in + fan_out)) ** 0.5
    return std * jax.random.normal(key, shape, dtype=jnp.float32)


def _conv3x3_as_matrix(conv_w, H, W):
    """(OC,1,3,3) filter -> (H*W, OC*OH*OW) matrix M such that x_flat @ M equals
    the valid 3x3 conv of the (H, W) single-channel image, with the output
    flattened in NCHW (oc, oh, ow) order (matches torch x.view(B, -1))."""
    cw = np.asarray(conv_w, dtype=np.float32)
    OC = cw.shape[0]
    OH, OW = H - 2, W - 2
    M = np.zeros((H * W, OC * OH * OW), np.float32)
    for oc in range(OC):
        for di in range(3):
            for dj in range(3):
                w = cw[oc, 0, di, dj]
                for oh in range(OH):
                    base = oc * OH * OW + oh * OW
                    for ow in range(OW):
                        M[(oh + di) * W + (ow + dj), base + ow] += w
    return M


# ---------------------------------------------------------------------------
# Kernel A: branch-tiled "frontend"; one grid step = one ConvE branch.
#   inputs : gathered head/relation embeddings (3,Bp,dim), shared fusion weights,
#            branch-indexed projection / conv-as-matmul / FC weights (squeezed)
#   output : hidden (4, Bp, dim) bf16  (ConvE hidden vector per branch)
# ---------------------------------------------------------------------------
def _frontend_kernel(e_ref, r_ref, fw_ref, fb_ref, rw_ref, rlb_ref,
                     pwe_ref, pwr_ref, pb_ref,
                     cmt_ref, cmb_ref, cvb_ref, fcw_ref, fcb_ref,
                     hid_ref):
    f32, bf16 = jnp.float32, jnp.bfloat16
    b = pl.program_id(0)                                 # 0=S, 1=T, 2=V, 3=MM

    e_s, e_t, e_v = e_ref[0], e_ref[1], e_ref[2]         # (Bp, dim) bf16
    r_s, r_t, r_v = r_ref[0], r_ref[1], r_ref[2]         # (Bp, dim) bf16

    # OnlyETProductLayer head/relation side (recomputed on every branch; a few
    # (Bp,dim)x(dim,dim) matmuls ~5% of one branch's MXU work).
    # TODO(synk): OnlyETProductLayer source not provided; fusion synthesized.
    acc = jnp.dot(e_s, fw_ref[0], preferred_element_type=f32)
    acc = acc + jnp.dot(e_t, fw_ref[1], preferred_element_type=f32)
    acc = acc + jnp.dot(e_v, fw_ref[2], preferred_element_type=f32)
    e_mm = jnp.tanh(acc + fb_ref[...]) + e_s.astype(f32)                  # (Bp, dim) f32
    r_mm = jnp.dot(r_s, rw_ref[...], preferred_element_type=f32) + rlb_ref[...]

    # exact 0/1 scalar masks select this branch's (e, r) pair (no i1 broadcasts)
    m0 = (b == 0).astype(f32)
    m1 = (b == 1).astype(f32)
    m2 = (b == 2).astype(f32)
    m3 = (b == 3).astype(f32)
    eb = (m0 * e_s + m1 * e_t + m2 * e_v + m3 * e_mm).astype(bf16)
    rb = (m0 * r_s + m1 * r_t + m2 * r_v + m3 * r_mm).astype(bf16)

    # projection Linear(2*dim -> dim) on concat(e, r)  (split weights: no concat)
    h = (jnp.dot(eb, pwe_ref[...], preferred_element_type=f32)
         + jnp.dot(rb, pwr_ref[...], preferred_element_type=f32)
         + pb_ref[...])                                                   # (Bp, dim)
    # ConvE 3x3 conv of the stacked (2*kh, kw) image as one matmul
    # (im2col + NCHW flatten folded into cm_top/cm_bot at init) + bias + ReLU.
    # TODO(synk): ConvELayer source not provided; canonical ConvE synthesized
    # (eval-mode BatchNorm/Dropout are identities and omitted).
    feat = (jnp.dot(h.astype(bf16), cmt_ref[...], preferred_element_type=f32)
            + jnp.dot(rb, cmb_ref[...], preferred_element_type=f32)
            + cvb_ref[...])
    feat = jnp.maximum(feat, 0.0)                                          # (Bp, FPAD)
    # FC + ReLU -> hidden
    hid = (jnp.dot(feat.astype(bf16), fcw_ref[...], preferred_element_type=f32)
           + fcb_ref[...])
    hid_ref[...] = jnp.maximum(hid, 0.0).astype(hid_ref.dtype)            # (Bp, dim)


# ---------------------------------------------------------------------------
# Kernel B: entity-tiled fused multimodal fusion + 4-way all-entity scoring.
#   Tables are stored pre-transposed as (dim, E): all matmuls are plain NN,
#   tiles are lane-dense.  Output is bf16; sigmoid uses exp + approx reciprocal.
# ---------------------------------------------------------------------------
def _fuse_score_kernel(hid_ref, ent_ref, txt_ref, img_ref,
                       fwt_ref, fbc_ref, sb_ref, out_ref):
    f32, bf16 = jnp.float32, jnp.bfloat16
    ent, txt, img = ent_ref[...], txt_ref[...], img_ref[...]       # (dim, T) bf16

    # multimodal fusion for this entity tile (column layout: W^T @ cols)
    acc = jnp.dot(fwt_ref[0], ent, preferred_element_type=f32)
    acc = acc + jnp.dot(fwt_ref[1], txt, preferred_element_type=f32)
    acc = acc + jnp.dot(fwt_ref[2], img, preferred_element_type=f32)
    ttmm = (jnp.tanh(acc + fbc_ref[...]) + ent.astype(f32)).astype(bf16)  # (dim, T)

    tables = (ent, txt, img, ttmm)
    sb = sb_ref[...]                                                # (4, T) f32
    for br in range(4):                                             # unrolled
        score = jnp.dot(hid_ref[br], tables[br], preferred_element_type=f32)  # (Bp, T)
        x = score + sb[br:br + 1]
        # numerically-safe sigmoid: one EUP exp + one EUP approx reciprocal
        z = jnp.exp(-jnp.abs(x))                                    # (0, 1]
        s = pl.reciprocal(1.0 + z, approx=True)
        p = jnp.where(x >= 0.0, s, 1.0 - s)
        out_ref[br] = jnp.clip(p, 0.0, 1.0).astype(out_ref.dtype)   # bf16


# ---------------------------------------------------------------------------
# Parameter initialization (deterministic, synthetic — mirrors __init__ shapes)
# ---------------------------------------------------------------------------
def init_params(key, num_ent, num_rel_base, dim, ent_tile_max=2048):
    num_rel = 2 * num_rel_base
    kh = int(round(dim ** 0.5))
    kw = kh
    assert kh * kw == dim, "dim must be a perfect square for the ConvE reshape"
    oc = 8
    H, W = 2 * kh, kw
    OH, OW = H - 2, W - 2
    flat = oc * OH * OW
    fpad = _round_up(flat, 128)              # lane-dense conv-feature width

    e_pad = _round_up(num_ent, 128)          # pad only to 128 (<=127 wasted cols)
    ent_tile = _pick_ent_tile(e_pad, ent_tile_max)

    ks = jax.random.split(key, 20)

    entity_emb = _xavier_normal(ks[0], (num_ent, dim))
    relation_emb = _xavier_normal(ks[1], (num_rel, dim))
    img_relation_emb = _xavier_normal(ks[2], (num_rel, dim))
    txt_relation_emb = _xavier_normal(ks[3], (num_rel, dim))

    # image features: raw (num_ent, 4kh, 4kw) -> AvgPool2d(4,4) -> (kh,kw) -> dim
    raw_img = jax.random.normal(ks[4], (num_ent, 4 * kh, 4 * kw), jnp.float32)
    img_entity_emb = raw_img.reshape(num_ent, kh, 4, kw, 4).mean(axis=(2, 4)).reshape(num_ent, dim)
    # text features: raw (num_ent, 12, dim) -> AdaptiveAvgPool2d((4, dim//4)) -> dim
    raw_txt = jax.random.normal(ks[5], (num_ent, 12, dim), jnp.float32)
    txt_entity_emb = raw_txt.reshape(num_ent, 4, 3, dim // 4, 4).mean(axis=(2, 4)).reshape(num_ent, dim)

    bf16 = jnp.bfloat16

    def to_cols(x):   # (num_ent, dim) -> (dim, e_pad) bf16 (zero-padded columns)
        xp = jnp.pad(x, ((0, e_pad - num_ent), (0, 0)))
        return jnp.transpose(xp).astype(bf16)

    # four projection Linears (2*dim -> dim): pre-transposed, split into e/r halves
    proj_we, proj_wr, proj_b = [], [], []
    for k in ks[6:10]:
        w = _xavier_normal(k, (dim, 2 * dim)).T             # (2*dim, dim)
        proj_we.append(w[:dim])
        proj_wr.append(w[dim:])
        proj_b.append(jnp.zeros((1, dim), jnp.float32))

    # four ConvE branches: conv folded into a matmul at init, fc transposed + row-padded
    # TODO(synk): ConvELayer source not provided; canonical ConvE synthesized.
    cm_top, cm_bot, conv_b_vec, fc_w, fc_b, score_b = [], [], [], [], [], []
    for k in ks[10:14]:
        kk = jax.random.split(k, 2)
        conv_w = 0.1 * jax.random.normal(kk[0], (oc, 1, 3, 3), jnp.float32)
        conv_b = jnp.zeros((oc,), jnp.float32)
        fcw = _xavier_normal(kk[1], (dim, flat))            # torch Linear layout (out, in)
        cm = np.pad(_conv3x3_as_matrix(conv_w, H, W), ((0, 0), (0, fpad - flat)))
        cm_top.append(cm[:dim])                             # rows for the e-image half
        cm_bot.append(cm[dim:])                             # rows for the r-image half
        conv_b_vec.append(jnp.pad(jnp.repeat(conv_b, OH * OW), (0, fpad - flat))[None, :])
        fc_w.append(jnp.pad(fcw.T, ((0, fpad - flat), (0, 0))))
        fc_b.append(jnp.zeros((1, dim), jnp.float32))
        score_b.append(jnp.zeros((e_pad,), jnp.float32))

    # OnlyETProductLayer weights.
    # TODO(synk): OnlyETProductLayer source not provided; fusion synthesized.
    # fuse_w rows de-interleaved once here to match torch.stack((e,t,i), dim=2) ordering.
    fuse_w_full = _xavier_normal(ks[14], (dim, 3 * dim)).T      # (3*dim, dim)
    fuse_w = jnp.stack([fuse_w_full[0::3], fuse_w_full[1::3], fuse_w_full[2::3]])
    rel_w = _xavier_normal(ks[15], (dim, dim)).T
    fuse_b = jnp.zeros((1, dim), jnp.float32)

    params = {
        # row-major bf16 copies for the per-batch head/relation gathers (Kernel A)
        "entity_emb": entity_emb.astype(bf16),
        "txt_entity_emb": txt_entity_emb.astype(bf16),
        "img_entity_emb": img_entity_emb.astype(bf16),
        "relation_emb": relation_emb.astype(bf16),
        "img_relation_emb": img_relation_emb.astype(bf16),
        "txt_relation_emb": txt_relation_emb.astype(bf16),
        # column-major (dim, e_pad) copies for all-entity scoring (Kernel B, NN matmuls)
        "entity_emb_t": to_cols(entity_emb),
        "txt_entity_emb_t": to_cols(txt_entity_emb),
        "img_entity_emb_t": to_cols(img_entity_emb),
        "proj_we": jnp.stack(proj_we).astype(bf16),         # (4, dim, dim)
        "proj_wr": jnp.stack(proj_wr).astype(bf16),         # (4, dim, dim)
        "proj_b": jnp.stack(proj_b),                        # (4, 1, dim) f32
        "cm_top": jnp.asarray(np.stack(cm_top)).astype(bf16),    # (4, dim, fpad)
        "cm_bot": jnp.asarray(np.stack(cm_bot)).astype(bf16),    # (4, dim, fpad)
        "conv_b": jnp.stack(conv_b_vec),                    # (4, 1, fpad) f32
        "fc_w": jnp.stack(fc_w).astype(bf16),               # (4, fpad, dim)
        "fc_b": jnp.stack(fc_b),                            # (4, 1, dim) f32
        "score_b": jnp.stack(score_b),                      # (4, e_pad) f32
        "fuse_w": fuse_w.astype(bf16),                      # (3, dim, dim): e @ W
        "fuse_w_t": jnp.transpose(fuse_w, (0, 2, 1)).astype(bf16),  # W^T @ cols
        "fuse_b": fuse_b,                                   # (1, dim) f32
        "fuse_b_col": fuse_b.T,                             # (dim, 1) f32
        "rel_w": rel_w.astype(bf16),                        # (dim, dim)
        "rel_b": jnp.zeros((1, dim), jnp.float32),
    }
    cfg = {"num_ent": num_ent, "e_pad": e_pad, "ent_tile": ent_tile,
           "dim": dim, "fpad": fpad}
    return params, cfg


# ---------------------------------------------------------------------------
# MoCi forward (model_split='decoder')
# ---------------------------------------------------------------------------
@functools.partial(jax.jit, static_argnames=("num_ent", "ent_tile"))
def moci_forward(params, batch_inputs, *, num_ent, ent_tile):
    B = batch_inputs.shape[0]
    B_pad = _round_up(max(B, 8), 8)          # sublane-align the streamed M dimension
    head = batch_inputs[:, 0]
    relation = batch_inputs[:, 1]
    if B_pad != B:
        head = jnp.pad(head, (0, B_pad - B))
        relation = jnp.pad(relation, (0, B_pad - B))

    dim = params["fuse_b"].shape[1]
    e_pad = params["entity_emb_t"].shape[1]
    fpad = params["cm_top"].shape[2]
    bf16 = jnp.bfloat16

    # tiny (B-row) gathers of the bf16 tables — left to XLA
    e_stack = jnp.stack([params["entity_emb"][head],
                         params["txt_entity_emb"][head],
                         params["img_entity_emb"][head]])            # (3, Bp, dim)
    r_stack = jnp.stack([params["relation_emb"][relation],
                         params["txt_relation_emb"][relation],
                         params["img_relation_emb"][relation]])      # (3, Bp, dim)

    # ---- Kernel A: branch-tiled frontend (fusion head side, projection, ConvE conv+FC)
    vmem_a = int(min(
        2 * ((2 * dim * dim + 2 * dim * fpad + fpad * dim) * 2)      # per-branch bf16 weights x2 bufs
        + 4 * (3 * B_pad * dim * 2)                                  # e/r stacks
        + 4 * (B_pad * dim * 2)                                      # hidden out
        + (4 * dim * dim) * 2 + (B_pad * fpad) * 4                   # fuse/rel weights + f32 feat
        + (16 << 20),
        64 << 20))
    hidden = pl.pallas_call(
        _frontend_kernel,
        out_shape=jax.ShapeDtypeStruct((4, B_pad, dim), bf16),
        grid=(4,),
        in_specs=[
            pl.BlockSpec((3, B_pad, dim), lambda b: (0, 0, 0)),       # e_stack
            pl.BlockSpec((3, B_pad, dim), lambda b: (0, 0, 0)),       # r_stack
            pl.BlockSpec((3, dim, dim), lambda b: (0, 0, 0)),         # fuse_w
            pl.BlockSpec((1, dim), lambda b: (0, 0)),                 # fuse_b
            pl.BlockSpec((dim, dim), lambda b: (0, 0)),               # rel_w
            pl.BlockSpec((1, dim), lambda b: (0, 0)),                 # rel_b
            pl.BlockSpec((None, dim, dim), lambda b: (b, 0, 0)),      # proj_we[b]
            pl.BlockSpec((None, dim, dim), lambda b: (b, 0, 0)),      # proj_wr[b]
            pl.BlockSpec((None, 1, dim), lambda b: (b, 0, 0)),        # proj_b[b]
            pl.BlockSpec((None, dim, fpad), lambda b: (b, 0, 0)),     # cm_top[b]
            pl.BlockSpec((None, dim, fpad), lambda b: (b, 0, 0)),     # cm_bot[b]
            pl.BlockSpec((None, 1, fpad), lambda b: (b, 0, 0)),       # conv_b[b]
            pl.BlockSpec((None, fpad, dim), lambda b: (b, 0, 0)),     # fc_w[b]
            pl.BlockSpec((None, 1, dim), lambda b: (b, 0, 0)),        # fc_b[b]
        ],
        out_specs=pl.BlockSpec((None, B_pad, dim), lambda b: (b, 0, 0)),
        compiler_params=pltpu.CompilerParams(
            dimension_semantics=("parallel",), vmem_limit_bytes=vmem_a),
    )(e_stack, r_stack, params["fuse_w"], params["fuse_b"],
      params["rel_w"], params["rel_b"],
      params["proj_we"], params["proj_wr"], params["proj_b"],
      params["cm_top"], params["cm_bot"], params["conv_b"],
      params["fc_w"], params["fc_b"])

    # ---- Kernel B: entity-tiled multimodal fusion + 4-way all-entity scoring
    n_tiles = e_pad // ent_tile
    vmem_b = int(min(
        2 * (3 * dim * ent_tile * 2)                   # entity/txt/img tiles x2 bufs
        + 2 * (4 * B_pad * ent_tile * 2)               # bf16 output tile x2 bufs
        + 2 * (4 * ent_tile * 4)                       # score biases
        + 2 * (4 * B_pad * dim * 2 + 3 * dim * dim * 2 + dim * 4)
        + (dim + 4 * B_pad) * ent_tile * 4             # f32 ttmm / score live values
        + (16 << 20),
        64 << 20))
    ce = pl.CostEstimate(
        flops=2 * e_pad * dim * (3 * dim + 4 * B_pad),
        transcendentals=e_pad * dim + 4 * B_pad * e_pad,
        bytes_accessed=3 * e_pad * dim * 2 + 4 * e_pad * 4 + 4 * B_pad * e_pad * 2,
    )
    preds = pl.pallas_call(
        _fuse_score_kernel,
        out_shape=jax.ShapeDtypeStruct((4, B_pad, e_pad), bf16),
        grid=(n_tiles,),
        in_specs=[
            pl.BlockSpec((4, B_pad, dim), lambda i: (0, 0, 0)),       # hidden
            pl.BlockSpec((dim, ent_tile), lambda i: (0, i)),          # entity cols
            pl.BlockSpec((dim, ent_tile), lambda i: (0, i)),          # txt cols
            pl.BlockSpec((dim, ent_tile), lambda i: (0, i)),          # img cols
            pl.BlockSpec((3, dim, dim), lambda i: (0, 0, 0)),         # fuse_w^T
            pl.BlockSpec((dim, 1), lambda i: (0, 0)),                 # fuse_b col
            pl.BlockSpec((4, ent_tile), lambda i: (0, i)),            # score biases
        ],
        out_specs=pl.BlockSpec((4, B_pad, ent_tile), lambda i: (0, 0, i)),
        compiler_params=pltpu.CompilerParams(
            dimension_semantics=("parallel",), vmem_limit_bytes=vmem_b),
        cost_estimate=ce,
    )(hidden, params["entity_emb_t"], params["txt_entity_emb_t"],
      params["img_entity_emb_t"], params["fuse_w_t"], params["fuse_b_col"],
      params["score_b"])

    # drop batch / 128-alignment padding (<= 7 rows, <= 127 cols); bf16 kept —
    # widen at the consumer only if needed.
    preds = preds[:, :B, :num_ent]
    return [preds[0], preds[1], preds[2], preds[3]]


if __name__ == "__main__":
    num_ent = 16          # len(args.entity2id)
    num_rel_base = 4      # len(args.relation2id)  -> num_rel = 8
    dim = 64              # args.dim == args.r_dim
    batch = 2

    key = jax.random.PRNGKey(0)
    pkey, ikey = jax.random.split(key)
    params, cfg = init_params(pkey, num_ent, num_rel_base, dim)

    heads = jax.random.randint(ikey, (batch,), 0, num_ent)
    rels = jax.random.randint(jax.random.fold_in(ikey, 1), (batch,), 0, 2 * num_rel_base)
    batch_inputs = jnp.stack([heads, rels], axis=1).astype(jnp.int32)   # (B, 2)

    out = moci_forward(params, batch_inputs,
                       num_ent=cfg["num_ent"], ent_tile=cfg["ent_tile"])
    out = jax.block_until_ready(out)

    assert len(out) == 4
    for o in out:
        assert o.shape == (batch, num_ent)
        assert bool(jnp.all((o >= 0.0) & (o <= 1.0)))   # sigmoid outputs
        assert bool(jnp.all(jnp.isfinite(o)))
    print("KERNEL_OK")
</pallas_src>

<mosaic_0001>
module attributes {stable_mosaic.version = 11 : i64} {
  func.func @_frontend_kernel(%arg0: i32, %arg1: memref<3x8x64xbf16, #tpu.memory_space<vmem>>, %arg2: memref<3x8x64xbf16, #tpu.memory_space<vmem>>, %arg3: memref<3x64x64xbf16, #tpu.memory_space<vmem>>, %arg4: memref<1x64xf32, #tpu.memory_space<vmem>>, %arg5: memref<64x64xbf16, #tpu.memory_space<vmem>>, %arg6: memref<1x64xf32, #tpu.memory_space<vmem>>, %arg7: memref<1x64x64xbf16, #tpu.memory_space<vmem>>, %arg8: memref<1x64x64xbf16, #tpu.memory_space<vmem>>, %arg9: memref<1x1x64xf32, #tpu.memory_space<vmem>>, %arg10: memref<1x64x768xbf16, #tpu.memory_space<vmem>>, %arg11: memref<1x64x768xbf16, #tpu.memory_space<vmem>>, %arg12: memref<1x1x768xf32, #tpu.memory_space<vmem>>, %arg13: memref<1x768x64xbf16, #tpu.memory_space<vmem>>, %arg14: memref<1x1x64xf32, #tpu.memory_space<vmem>>, %arg15: memref<1x8x64xbf16, #tpu.memory_space<vmem>>) attributes {dimension_semantics = [#tpu.dimension_semantics<parallel>], iteration_bounds = array<i64: 4>, scalar_prefetch = 0 : i64, scratch_operands = 0 : i64, tpu.core_type = #tpu.core_type<tc>, window_params = [{pipeline_mode = #tpu.pipeline_mode<synchronous>, transform_indices = @transform_0, window_bounds = array<i64: 3, 8, 64>}, {pipeline_mode = #tpu.pipeline_mode<synchronous>, transform_indices = @transform_1, window_bounds = array<i64: 3, 8, 64>}, {pipeline_mode = #tpu.pipeline_mode<synchronous>, transform_indices = @transform_2, window_bounds = array<i64: 3, 64, 64>}, {pipeline_mode = #tpu.pipeline_mode<synchronous>, transform_indices = @transform_3, window_bounds = array<i64: 1, 64>}, {pipeline_mode = #tpu.pipeline_mode<synchronous>, transform_indices = @transform_4, window_bounds = array<i64: 64, 64>}, {pipeline_mode = #tpu.pipeline_mode<synchronous>, transform_indices = @transform_5, window_bounds = array<i64: 1, 64>}, {transform_indices = @transform_6, window_bounds = array<i64: 1, 64, 64>}, {transform_indices = @transform_7, window_bounds = array<i64: 1, 64, 64>}, {transform_indices = @transform_8, window_bounds = array<i64: 1, 1, 64>}, {transform_indices = @transform_9, window_bounds = array<i64: 1, 64, 768>}, {transform_indices = @transform_10, window_bounds = array<i64: 1, 64, 768>}, {transform_indices = @transform_11, window_bounds = array<i64: 1, 1, 768>}, {transform_indices = @transform_12, window_bounds = array<i64: 1, 768, 64>}, {transform_indices = @transform_13, window_bounds = array<i64: 1, 1, 64>}, {transform_indices = @transform_14, window_bounds = array<i64: 1, 8, 64>}]} {
    %c0 = arith.constant 0 : index
    %c0_0 = arith.constant 0 : index
    %c0_1 = arith.constant 0 : index
    %0 = vector.load %arg1[%c0, %c0_0, %c0_1] : memref<3x8x64xbf16, #tpu.memory_space<vmem>>, vector<1x8x64xbf16>
    %1 = vector.shape_cast %0 : vector<1x8x64xbf16> to vector<8x64xbf16>
    %c1 = arith.constant 1 : index
    %c0_2 = arith.constant 0 : index
    %c0_3 = arith.constant 0 : index
    %2 = vector.load %arg1[%c1, %c0_2, %c0_3] : memref<3x8x64xbf16, #tpu.memory_space<vmem>>, vector<1x8x64xbf16>
    %3 = vector.shape_cast %2 : vector<1x8x64xbf16> to vector<8x64xbf16>
    %c2 = arith.constant 2 : index
    %c0_4 = arith.constant 0 : index
    %c0_5 = arith.constant 0 : index
    %4 = vector.load %arg1[%c2, %c0_4, %c0_5] : memref<3x8x64xbf16, #tpu.memory_space<vmem>>, vector<1x8x64xbf16>
    %5 = vector.shape_cast %4 : vector<1x8x64xbf16> to vector<8x64xbf16>
    %c0_6 = arith.constant 0 : index
    %c0_7 = arith.constant 0 : index
    %c0_8 = arith.constant 0 : index
    %6 = vector.load %arg2[%c0_6, %c0_7, %c0_8] : memref<3x8x64xbf16, #tpu.memory_space<vmem>>, vector<1x8x64xbf16>
    %7 = vector.shape_cast %6 : vector<1x8x64xbf16> to vector<8x64xbf16>
    %c1_9 = arith.constant 1 : index
    %c0_10 = arith.constant 0 : index
    %c0_11 = arith.constant 0 : index
    %8 = vector.load %arg2[%c1_9, %c0_10, %c0_11] : memref<3x8x64xbf16, #tpu.memory_space<vmem>>, vector<1x8x64xbf16>
    %9 = vector.shape_cast %8 : vector<1x8x64xbf16> to vector<8x64xbf16>
    %c2_12 = arith.constant 2 : index
    %c0_13 = arith.constant 0 : index
    %c0_14 = arith.constant 0 : index
    %10 = vector.load %arg2[%c2_12, %c0_13, %c0_14] : memref<3x8x64xbf16, #tpu.memory_space<vmem>>, vector<1x8x64xbf16>
    %11 = vector.shape_cast %10 : vector<1x8x64xbf16> to vector<8x64xbf16>
    %c0_15 = arith.constant 0 : index
    %c0_16 = arith.constant 0 : index
    %c0_17 = arith.constant 0 : index
    %12 = vector.load %arg3[%c0_15, %c0_16, %c0_17] : memref<3x64x64xbf16, #tpu.memory_space<vmem>>, vector<1x64x64xbf16>
    %13 = vector.shape_cast %12 : vector<1x64x64xbf16> to vector<64x64xbf16>
    %cst = arith.constant dense<0.000000e+00> : vector<8x64xf32>
    %14 = tpu.matmul %1, %13, %cst {dimension_numbers = #tpu.dot_dimension_numbers<[1], [0], [0], [1], [0, 0, 1, 1], [], []>} : vector<8x64xbf16>, vector<64x64xbf16>, vector<8x64xf32> -> vector<8x64xf32>
    %c1_18 = arith.constant 1 : index
    %c0_19 = arith.constant 0 : index
    %c0_20 = arith.constant 0 : index
    %15 = vector.load %arg3[%c1_18, %c0_19, %c0_20] : memref<3x64x64xbf16, #tpu.memory_space<vmem>>, vector<1x64x64xbf16>
    %16 = vector.shape_cast %15 : vector<1x64x64xbf16> to vector<64x64xbf16>
    %cst_21 = arith.constant dense<0.000000e+00> : vector<8x64xf32>
    %17 = tpu.matmul %3, %16, %cst_21 {dimension_numbers = #tpu.dot_dimension_numbers<[1], [0], [0], [1], [0, 0, 1, 1], [], []>} : vector<8x64xbf16>, vector<64x64xbf16>, vector<8x64xf32> -> vector<8x64xf32>
    %18 = arith.addf %14, %17 : vector<8x64xf32>
    %c2_22 = arith.constant 2 : index
    %c0_23 = arith.constant 0 : index
    %c0_24 = arith.constant 0 : index
    %19 = vector.load %arg3[%c2_22, %c0_23, %c0_24] : memref<3x64x64xbf16, #tpu.memory_space<vmem>>, vector<1x64x64xbf16>
    %20 = vector.shape_cast %19 : vector<1x64x64xbf16> to vector<64x64xbf16>
    %cst_25 = arith.constant dense<0.000000e+00> : vector<8x64xf32>
    %21 = tpu.matmul %5, %20, %cst_25 {dimension_numbers = #tpu.dot_dimension_numbers<[1], [0], [0], [1], [0, 0, 1, 1], [], []>} : vector<8x64xbf16>, vector<64x64xbf16>, vector<8x64xf32> -> vector<8x64xf32>
    %22 = arith.addf %18, %21 : vector<8x64xf32>
    %c0_26 = arith.constant 0 : index
    %c0_27 = arith.constant 0 : index
    %23 = vector.load %arg4[%c0_26, %c0_27] : memref<1x64xf32, #tpu.memory_space<vmem>>, vector<1x64xf32>
    %24 = vector.broadcast %23 : vector<1x64xf32> to vector<8x64xf32>
    %25 = arith.addf %22, %24 : vector<8x64xf32>
    %26 = math.tanh %25 : vector<8x64xf32>
    %27 = arith.extf %1 : vector<8x64xbf16> to vector<8x64xf32>
    %28 = arith.addf %26, %27 : vector<8x64xf32>
    %c0_28 = arith.constant 0 : index
    %c0_29 = arith.constant 0 : index
    %29 = vector.load %arg5[%c0_28, %c0_29] : memref<64x64xbf16, #tpu.memory_space<vmem>>, vector<64x64xbf16>
    %cst_30 = arith.constant dense<0.000000e+00> : vector<8x64xf32>
    %30 = tpu.matmul %7, %29, %cst_30 {dimension_numbers = #tpu.dot_dimension_numbers<[1], [0], [0], [1], [0, 0, 1, 1], [], []>} : vector<8x64xbf16>, vector<64x64xbf16>, vector<8x64xf32> -> vector<8x64xf32>
    %c0_31 = arith.constant 0 : index
    %c0_32 = arith.constant 0 : index
    %31 = vector.load %arg6[%c0_31, %c0_32] : memref<1x64xf32, #tpu.memory_space<vmem>>, vector<1x64xf32>
    %32 = vector.broadcast %31 : vector<1x64xf32> to vector<8x64xf32>
    %33 = arith.addf %30, %32 : vector<8x64xf32>
    %c0_i32 = arith.constant 0 : i32
    %34 = arith.cmpi eq, %arg0, %c0_i32 : i32
    %35 = arith.extui %34 : i1 to i32
    %36 = arith.sitofp %35 : i32 to f32
    %c1_i32 = arith.constant 1 : i32
    %37 = arith.cmpi eq, %arg0, %c1_i32 : i32
    %38 = arith.extui %37 : i1 to i32
    %39 = arith.sitofp %38 : i32 to f32
    %c2_i32 = arith.constant 2 : i32
    %40 = arith.cmpi eq, %arg0, %c2_i32 : i32
    %41 = arith.extui %40 : i1 to i32
    %42 = arith.sitofp %41 : i32 to f32
    %c3_i32 = arith.constant 3 : i32
    %43 = arith.cmpi eq, %arg0, %c3_i32 : i32
    %44 = arith.extui %43 : i1 to i32
    %45 = arith.sitofp %44 : i32 to f32
    %46 = arith.extf %1 : vector<8x64xbf16> to vector<8x64xf32>
    %47 = vector.broadcast %36 : f32 to vector<8x64xf32>
    %48 = arith.mulf %47, %46 : vector<8x64xf32>
    %49 = arith.extf %3 : vector<8x64xbf16> to vector<8x64xf32>
    %50 = vector.broadcast %39 : f32 to vector<8x64xf32>
    %51 = arith.mulf %50, %49 : vector<8x64xf32>
    %52 = arith.addf %48, %51 : vector<8x64xf32>
    %53 = arith.extf %5 : vector<8x64xbf16> to vector<8x64xf32>
    %54 = vector.broadcast %42 : f32 to vector<8x64xf32>
    %55 = arith.mulf %54, %53 : vector<8x64xf32>
    %56 = arith.addf %52, %55 : vector<8x64xf32>
    %57 = vector.broadcast %45 : f32 to vector<8x64xf32>
    %58 = arith.mulf %57, %28 : vector<8x64xf32>
    %59 = arith.addf %56, %58 : vector<8x64xf32>
    %60 = arith.truncf %59 : vector<8x64xf32> to vector<8x64xbf16>
    %61 = arith.extf %7 : vector<8x64xbf16> to vector<8x64xf32>
    %62 = vector.broadcast %36 : f32 to vector<8x64xf32>
    %63 = arith.mulf %62, %61 : vector<8x64xf32>
    %64 = arith.extf %9 : vector<8x64xbf16> to vector<8x64xf32>
    %65 = vector.broadcast %39 : f32 to vector<8x64xf32>
    %66 = arith.mulf %65, %64 : vector<8x64xf32>
    %67 = arith.addf %63, %66 : vector<8x64xf32>
    %68 = arith.extf %11 : vector<8x64xbf16> to vector<8x64xf32>
    %69 = vector.broadcast %42 : f32 to vector<8x64xf32>
    %70 = arith.mulf %69, %68 : vector<8x64xf32>
    %71 = arith.addf %67, %70 : vector<8x64xf32>
    %72 = vector.broadcast %45 : f32 to vector<8x64xf32>
    %73 = arith.mulf %72, %33 : vector<8x64xf32>
    %74 = arith.addf %71, %73 : vector<8x64xf32>
    %75 = arith.truncf %74 : vector<8x64xf32> to vector<8x64xbf16>
    %c0_33 = arith.constant 0 : index
    %c0_34 = arith.constant 0 : index
    %c0_35 = arith.constant 0 : index
    %76 = vector.load %arg7[%c0_33, %c0_34, %c0_35] : memref<1x64x64xbf16, #tpu.memory_space<vmem>>, vector<1x64x64xbf16>
    %77 = vector.shape_cast %76 : vector<1x64x64xbf16> to vector<64x64xbf16>
    %cst_36 = arith.constant dense<0.000000e+00> : vector<8x64xf32>
    %78 = tpu.matmul %60, %77, %cst_36 {dimension_numbers = #tpu.dot_dimension_numbers<[1], [0], [0], [1], [0, 0, 1, 1], [], []>} : vector<8x64xbf16>, vector<64x64xbf16>, vector<8x64xf32> -> vector<8x64xf32>
    %c0_37 = arith.constant 0 : index
    %c0_38 = arith.constant 0 : index
    %c0_39 = arith.constant 0 : index
    %79 = vector.load %arg8[%c0_37, %c0_38, %c0_39] : memref<1x64x64xbf16, #tpu.memory_space<vmem>>, vector<1x64x64xbf16>
    %80 = vector.shape_cast %79 : vector<1x64x64xbf16> to vector<64x64xbf16>
    %cst_40 = arith.constant dense<0.000000e+00> : vector<8x64xf32>
    %81 = tpu.matmul %75, %80, %cst_40 {dimension_numbers = #tpu.dot_dimension_numbers<[1], [0], [0], [1], [0, 0, 1, 1], [], []>} : vector<8x64xbf16>, vector<64x64xbf16>, vector<8x64xf32> -> vector<8x64xf32>
    %82 = arith.addf %78, %81 : vector<8x64xf32>
    %c0_41 = arith.constant 0 : index
    %c0_42 = arith.constant 0 : index
    %c0_43 = arith.constant 0 : index
    %83 = vector.load %arg9[%c0_41, %c0_42, %c0_43] : memref<1x1x64xf32, #tpu.memory_space<vmem>>, vector<1x1x64xf32>
    %84 = vector.shape_cast %83 : vector<1x1x64xf32> to vector<1x64xf32>
    %85 = vector.broadcast %84 : vector<1x64xf32> to vector<8x64xf32>
    %86 = arith.addf %82, %85 : vector<8x64xf32>
    %87 = arith.truncf %86 : vector<8x64xf32> to vector<8x64xbf16>
    %c0_44 = arith.constant 0 : index
    %c0_45 = arith.constant 0 : index
    %c0_46 = arith.constant 0 : index
    %88 = vector.load %arg10[%c0_44, %c0_45, %c0_46] : memref<1x64x768xbf16, #tpu.memory_space<vmem>>, vector<1x64x768xbf16>
    %89 = vector.shape_cast %88 : vector<1x64x768xbf16> to vector<64x768xbf16>
    %cst_47 = arith.constant dense<0.000000e+00> : vector<8x768xf32>
    %90 = tpu.matmul %87, %89, %cst_47 {dimension_numbers = #tpu.dot_dimension_numbers<[1], [0], [0], [1], [0, 0, 1, 1], [], []>} : vector<8x64xbf16>, vector<64x768xbf16>, vector<8x768xf32> -> vector<8x768xf32>
    %c0_48 = arith.constant 0 : index
    %c0_49 = arith.constant 0 : index
    %c0_50 = arith.constant 0 : index
    %91 = vector.load %arg11[%c0_48, %c0_49, %c0_50] : memref<1x64x768xbf16, #tpu.memory_space<vmem>>, vector<1x64x768xbf16>
    %92 = vector.shape_cast %91 : vector<1x64x768xbf16> to vector<64x768xbf16>
    %cst_51 = arith.constant dense<0.000000e+00> : vector<8x768xf32>
    %93 = tpu.matmul %75, %92, %cst_51 {dimension_numbers = #tpu.dot_dimension_numbers<[1], [0], [0], [1], [0, 0, 1, 1], [], []>} : vector<8x64xbf16>, vector<64x768xbf16>, vector<8x768xf32> -> vector<8x768xf32>
    %94 = arith.addf %90, %93 : vector<8x768xf32>
    %c0_52 = arith.constant 0 : index
    %c0_53 = arith.constant 0 : index
    %c0_54 = arith.constant 0 : index
    %95 = vector.load %arg12[%c0_52, %c0_53, %c0_54] : memref<1x1x768xf32, #tpu.memory_space<vmem>>, vector<1x1x768xf32>
    %96 = vector.shape_cast %95 : vector<1x1x768xf32> to vector<1x768xf32>
    %97 = vector.broadcast %96 : vector<1x768xf32> to vector<8x768xf32>
    %98 = arith.addf %94, %97 : vector<8x768xf32>
    %cst_55 = arith.constant 0.000000e+00 : f32
    %99 = vector.broadcast %cst_55 : f32 to vector<8x768xf32>
    %100 = arith.maximumf %98, %99 : vector<8x768xf32>
    %101 = arith.truncf %100 : vector<8x768xf32> to vector<8x768xbf16>
    %c0_56 = arith.constant 0 : index
    %c0_57 = arith.constant 0 : index
    %c0_58 = arith.constant 0 : index
    %102 = vector.load %arg13[%c0_56, %c0_57, %c0_58] : memref<1x768x64xbf16, #tpu.memory_space<vmem>>, vector<1x768x64xbf16>
    %103 = vector.shape_cast %102 : vector<1x768x64xbf16> to vector<768x64xbf16>
    %cst_59 = arith.constant dense<0.000000e+00> : vector<8x64xf32>
    %104 = tpu.matmul %101, %103, %cst_59 {dimension_numbers = #tpu.dot_dimension_numbers<[1], [0], [0], [1], [0, 0, 1, 1], [], []>} : vector<8x768xbf16>, vector<768x64xbf16>, vector<8x64xf32> -> vector<8x64xf32>
    %c0_60 = arith.constant 0 : index
    %c0_61 = arith.constant 0 : index
    %c0_62 = arith.constant 0 : index
    %105 = vector.load %arg14[%c0_60, %c0_61, %c0_62] : memref<1x1x64xf32, #tpu.memory_space<vmem>>, vector<1x1x64xf32>
    %106 = vector.shape_cast %105 : vector<1x1x64xf32> to vector<1x64xf32>
    %107 = vector.broadcast %106 : vector<1x64xf32> to vector<8x64xf32>
    %108 = arith.addf %104, %107 : vector<8x64xf32>
    %cst_63 = arith.constant 0.000000e+00 : f32
    %109 = vector.broadcast %cst_63 : f32 to vector<8x64xf32>
    %110 = arith.maximumf %108, %109 : vector<8x64xf32>
    %111 = arith.truncf %110 : vector<8x64xf32> to vector<8x64xbf16>
    %c0_64 = arith.constant 0 : index
    %c0_65 = arith.constant 0 : index
    %c0_66 = arith.constant 0 : index
    %112 = vector.load %arg15[%c0_64, %c0_65, %c0_66] : memref<1x8x64xbf16, #tpu.memory_space<vmem>>, vector<1x8x64xbf16>
    %113 = vector.shape_cast %112 : vector<1x8x64xbf16> to vector<8x64xbf16>
    %114 = vector.shape_cast %111 : vector<8x64xbf16> to vector<1x8x64xbf16>
    tpu.vector_store %arg15[%c0_64, %c0_65, %c0_66], %114 {strides = array<i32>} : memref<1x8x64xbf16, #tpu.memory_space<vmem>>, vector<1x8x64xbf16>,
    return
  }
  func.func @transform_0(%arg0: i32) -> (i32, i32, i32) {
    %c0_i32 = arith.constant 0 : i32
    %c0_i32_0 = arith.constant 0 : i32
    %c0_i32_1 = arith.constant 0 : i32
    %c0_i32_2 = arith.constant 0 : i32
    return %c0_i32, %c0_i32_0, %c0_i32_1 : i32, i32, i32
  }
  func.func @transform_1(%arg0: i32) -> (i32, i32, i32) {
    %c0_i32 = arith.constant 0 : i32
    %c0_i32_0 = arith.constant 0 : i32
    %c0_i32_1 = arith.constant 0 : i32
    %c0_i32_2 = arith.constant 0 : i32
    return %c0_i32, %c0_i32_0, %c0_i32_1 : i32, i32, i32
  }
  func.func @transform_2(%arg0: i32) -> (i32, i32, i32) {
    %c0_i32 = arith.constant 0 : i32
    %c0_i32_0 = arith.constant 0 : i32
    %c0_i32_1 = arith.constant 0 : i32
    %c0_i32_2 = arith.constant 0 : i32
    return %c0_i32, %c0_i32_0, %c0_i32_1 : i32, i32, i32
  }
  func.func @transform_3(%arg0: i32) -> (i32, i32) {
    %c0_i32 = arith.constant 0 : i32
    %c0_i32_0 = arith.constant 0 : i32
    %c0_i32_1 = arith.constant 0 : i32
    return %c0_i32, %c0_i32_0 : i32, i32
  }
  func.func @transform_4(%arg0: i32) -> (i32, i32) {
    %c0_i32 = arith.constant 0 : i32
    %c0_i32_0 = arith.constant 0 : i32
    %c0_i32_1 = arith.constant 0 : i32
    return %c0_i32, %c0_i32_0 : i32, i32
  }
  func.func @transform_5(%arg0: i32) -> (i32, i32) {
    %c0_i32 = arith.constant 0 : i32
    %c0_i32_0 = arith.constant 0 : i32
    %c0_i32_1 = arith.constant 0 : i32
    return %c0_i32, %c0_i32_0 : i32, i32
  }
  func.func @transform_6(%arg0: i32) -> (i32, i32, i32) {
    %c0_i32 = arith.constant 0 : i32
    %c0_i32_0 = arith.constant 0 : i32
    %c0_i32_1 = arith.constant 0 : i32
    return %arg0, %c0_i32, %c0_i32_0 : i32, i32, i32
  }
  func.func @transform_7(%arg0: i32) -> (i32, i32, i32) {
    %c0_i32 = arith.constant 0 : i32
    %c0_i32_0 = arith.constant 0 : i32
    %c0_i32_1 = arith.constant 0 : i32
    return %arg0, %c0_i32, %c0_i32_0 : i32, i32, i32
  }
  func.func @transform_8(%arg0: i32) -> (i32, i32, i32) {
    %c0_i32 = arith.constant 0 : i32
    %c0_i32_0 = arith.constant 0 : i32
    %c0_i32_1 = arith.constant 0 : i32
    return %arg0, %c0_i32, %c0_i32_0 : i32, i32, i32
  }
  func.func @transform_9(%arg0: i32) -> (i32, i32, i32) {
    %c0_i32 = arith.constant 0 : i32
    %c0_i32_0 = arith.constant 0 : i32
    %c0_i32_1 = arith.constant 0 : i32
    return %arg0, %c0_i32, %c0_i32_0 : i32, i32, i32
  }
  func.func @transform_10(%arg0: i32) -> (i32, i32, i32) {
    %c0_i32 = arith.constant 0 : i32
    %c0_i32_0 = arith.constant 0 : i32
    %c0_i32_1 = arith.constant 0 : i32
    return %arg0, %c0_i32, %c0_i32_0 : i32, i32, i32
  }
  func.func @transform_11(%arg0: i32) -> (i32, i32, i32) {
    %c0_i32 = arith.constant 0 : i32
    %c0_i32_0 = arith.constant 0 : i32
    %c0_i32_1 = arith.constant 0 : i32
    return %arg0, %c0_i32, %c0_i32_0 : i32, i32, i32
  }
  func.func @transform_12(%arg0: i32) -> (i32, i32, i32) {
    %c0_i32 = arith.constant 0 : i32
    %c0_i32_0 = arith.constant 0 : i32
    %c0_i32_1 = arith.constant 0 : i32
    return %arg0, %c0_i32, %c0_i32_0 : i32, i32, i32
  }
  func.func @transform_13(%arg0: i32) -> (i32, i32, i32) {
    %c0_i32 = arith.constant 0 : i32
    %c0_i32_0 = arith.constant 0 : i32
    %c0_i32_1 = arith.constant 0 : i32
    return %arg0, %c0_i32, %c0_i32_0 : i32, i32, i32
  }
  func.func @transform_14(%arg0: i32) -> (i32, i32, i32) {
    %c0_i32 = arith.constant 0 : i32
    %c0_i32_0 = arith.constant 0 : i32
    %c0_i32_1 = arith.constant 0 : i32
    return %arg0, %c0_i32, %c0_i32_0 : i32, i32, i32
  }
}

module attributes {stable_mosaic.version = 11 : i64} {
  func.func @_fuse_score_kernel(%arg0: i32, %arg1: memref<4x8x64xbf16, #tpu.memory_space<vmem>>, %arg2: memref<64x128xbf16, #tpu.memory_space<vmem>>, %arg3: memref<64x128xbf16, #tpu.memory_space<vmem>>, %arg4: memref<64x128xbf16, #tpu.memory_space<vmem>>, %arg5: memref<3x64x64xbf16, #tpu.memory_space<vmem>>, %arg6: memref<64x1xf32, #tpu.memory_space<vmem>>, %arg7: memref<4x128xf32, #tpu.memory_space<vmem>>, %arg8: memref<4x8x128xbf16, #tpu.memory_space<vmem>>) attributes {dimension_semantics = [#tpu.dimension_semantics<parallel>], iteration_bounds = array<i64: 1>, scalar_prefetch = 0 : i64, scratch_operands = 0 : i64, tpu.core_type = #tpu.core_type<tc>, window_params = [{pipeline_mode = #tpu.pipeline_mode<synchronous>, transform_indices = @transform_0, window_bounds = array<i64: 4, 8, 64>}, {transform_indices = @transform_1, window_bounds = array<i64: 64, 128>}, {transform_indices = @transform_2, window_bounds = array<i64: 64, 128>}, {transform_indices = @transform_3, window_bounds = array<i64: 64, 128>}, {pipeline_mode = #tpu.pipeline_mode<synchronous>, transform_indices = @transform_4, window_bounds = array<i64: 3, 64, 64>}, {pipeline_mode = #tpu.pipeline_mode<synchronous>, transform_indices = @transform_5, window_bounds = array<i64: 64, 1>}, {transform_indices = @transform_6, window_bounds = array<i64: 4, 128>}, {transform_indices = @transform_7, window_bounds = array<i64: 4, 8, 128>}]} {
    %c0 = arith.constant 0 : index
    %c0_0 = arith.constant 0 : index
    %0 = vector.load %arg2[%c0, %c0_0] : memref<64x128xbf16, #tpu.memory_space<vmem>>, vector<64x128xbf16>
    %c0_1 = arith.constant 0 : index
    %c0_2 = arith.constant 0 : index
    %1 = vector.load %arg3[%c0_1, %c0_2] : memref<64x128xbf16, #tpu.memory_space<vmem>>, vector<64x128xbf16>
    %c0_3 = arith.constant 0 : index
    %c0_4 = arith.constant 0 : index
    %2 = vector.load %arg4[%c0_3, %c0_4] : memref<64x128xbf16, #tpu.memory_space<vmem>>, vector<64x128xbf16>
    %c0_5 = arith.constant 0 : index
    %c0_6 = arith.constant 0 : index
    %c0_7 = arith.constant 0 : index
    %3 = vector.load %arg5[%c0_5, %c0_6, %c0_7] : memref<3x64x64xbf16, #tpu.memory_space<vmem>>, vector<1x64x64xbf16>
    %4 = vector.shape_cast %3 : vector<1x64x64xbf16> to vector<64x64xbf16>
    %cst = arith.constant dense<0.000000e+00> : vector<64x128xf32>
    %5 = tpu.matmul %4, %0, %cst {dimension_numbers = #tpu.dot_dimension_numbers<[1], [0], [0], [1], [0, 0, 1, 1], [], []>} : vector<64x64xbf16>, vector<64x128xbf16>, vector<64x128xf32> -> vector<64x128xf32>
    %c1 = arith.constant 1 : index
    %c0_8 = arith.constant 0 : index
    %c0_9 = arith.constant 0 : index
    %6 = vector.load %arg5[%c1, %c0_8, %c0_9] : memref<3x64x64xbf16, #tpu.memory_space<vmem>>, vector<1x64x64xbf16>
    %7 = vector.shape_cast %6 : vector<1x64x64xbf16> to vector<64x64xbf16>
    %cst_10 = arith.constant dense<0.000000e+00> : vector<64x128xf32>
    %8 = tpu.matmul %7, %1, %cst_10 {dimension_numbers = #tpu.dot_dimension_numbers<[1], [0], [0], [1], [0, 0, 1, 1], [], []>} : vector<64x64xbf16>, vector<64x128xbf16>, vector<64x128xf32> -> vector<64x128xf32>
    %9 = arith.addf %5, %8 : vector<64x128xf32>
    %c2 = arith.constant 2 : index
    %c0_11 = arith.constant 0 : index
    %c0_12 = arith.constant 0 : index
    %10 = vector.load %arg5[%c2, %c0_11, %c0_12] : memref<3x64x64xbf16, #tpu.memory_space<vmem>>, vector<1x64x64xbf16>
    %11 = vector.shape_cast %10 : vector<1x64x64xbf16> to vector<64x64xbf16>
    %cst_13 = arith.constant dense<0.000000e+00> : vector<64x128xf32>
    %12 = tpu.matmul %11, %2, %cst_13 {dimension_numbers = #tpu.dot_dimension_numbers<[1], [0], [0], [1], [0, 0, 1, 1], [], []>} : vector<64x64xbf16>, vector<64x128xbf16>, vector<64x128xf32> -> vector<64x128xf32>
    %13 = arith.addf %9, %12 : vector<64x128xf32>
    %c0_14 = arith.constant 0 : index
    %c0_15 = arith.constant 0 : index
    %14 = vector.load %arg6[%c0_14, %c0_15] : memref<64x1xf32, #tpu.memory_space<vmem>>, vector<64x1xf32>
    %15 = vector.broadcast %14 : vector<64x1xf32> to vector<64x128xf32>
    %16 = arith.addf %13, %15 : vector<64x128xf32>
    %17 = math.tanh %16 : vector<64x128xf32>
    %18 = arith.extf %0 : vector<64x128xbf16> to vector<64x128xf32>
    %19 = arith.addf %17, %18 : vector<64x128xf32>
    %20 = arith.truncf %19 : vector<64x128xf32> to vector<64x128xbf16>
    %c0_16 = arith.constant 0 : index
    %c0_17 = arith.constant 0 : index
    %21 = vector.load %arg7[%c0_16, %c0_17] : memref<4x128xf32, #tpu.memory_space<vmem>>, vector<4x128xf32>
    %c0_18 = arith.constant 0 : index
    %c0_19 = arith.constant 0 : index
    %c0_20 = arith.constant 0 : index
    %22 = vector.load %arg1[%c0_18, %c0_19, %c0_20] : memref<4x8x64xbf16, #tpu.memory_space<vmem>>, vector<1x8x64xbf16>
    %23 = vector.shape_cast %22 : vector<1x8x64xbf16> to vector<8x64xbf16>
    %cst_21 = arith.constant dense<0.000000e+00> : vector<8x128xf32>
    %24 = tpu.matmul %23, %0, %cst_21 {dimension_numbers = #tpu.dot_dimension_numbers<[1], [0], [0], [1], [0, 0, 1, 1], [], []>} : vector<8x64xbf16>, vector<64x128xbf16>, vector<8x128xf32> -> vector<8x128xf32>
    %25 = vector.extract_strided_slice %21 {offsets = [0, 0], sizes = [1, 128], strides = [1, 1]} : vector<4x128xf32> to vector<1x128xf32>
    %26 = vector.broadcast %25 : vector<1x128xf32> to vector<8x128xf32>
    %27 = arith.addf %24, %26 : vector<8x128xf32>
    %28 = math.absf %27 : vector<8x128xf32>
    %cst_22 = arith.constant 0.000000e+00 : f32
    %29 = vector.broadcast %cst_22 : f32 to vector<8x128xf32>
    %30 = arith.subf %29, %28 : vector<8x128xf32>
    %31 = math.exp %30 : vector<8x128xf32>
    %cst_23 = arith.constant 1.000000e+00 : f32
    %32 = vector.broadcast %cst_23 : f32 to vector<8x128xf32>
    %33 = arith.addf %32, %31 : vector<8x128xf32>
    %34 = tpu.reciprocal %33 {approx = true} : vector<8x128xf32> -> vector<8x128xf32>
    %cst_24 = arith.constant 0.000000e+00 : f32
    %35 = vector.broadcast %cst_24 : f32 to vector<8x128xf32>
    %36 = arith.cmpf oge, %27, %35 : vector<8x128xf32>
    %cst_25 = arith.constant 1.000000e+00 : f32
    %37 = vector.broadcast %cst_25 : f32 to vector<8x128xf32>
    %38 = arith.subf %37, %34 : vector<8x128xf32>
    %39 = arith.select %36, %34, %38 : vector<8x128xi1>, vector<8x128xf32>
    %cst_26 = arith.constant 0.000000e+00 : f32
    %cst_27 = arith.constant 1.000000e+00 : f32
    %40 = vector.broadcast %cst_26 : f32 to vector<8x128xf32>
    %41 = arith.maximumf %40, %39 : vector<8x128xf32>
    %42 = vector.broadcast %cst_27 : f32 to vector<8x128xf32>
    %43 = arith.minimumf %42, %41 : vector<8x128xf32>
    %44 = arith.truncf %43 : vector<8x128xf32> to vector<8x128xbf16>
    %c0_28 = arith.constant 0 : index
    %c0_29 = arith.constant 0 : index
    %c0_30 = arith.constant 0 : index
    %45 = vector.load %arg8[%c0_28, %c0_29, %c0_30] : memref<4x8x128xbf16, #tpu.memory_space<vmem>>, vector<1x8x128xbf16>
    %46 = vector.shape_cast %45 : vector<1x8x128xbf16> to vector<8x128xbf16>
    %47 = vector.shape_cast %44 : vector<8x128xbf16> to vector<1x8x128xbf16>
    tpu.vector_store %arg8[%c0_28, %c0_29, %c0_30], %47 {strides = array<i32>} : memref<4x8x128xbf16, #tpu.memory_space<vmem>>, vector<1x8x128xbf16>,
    %c1_31 = arith.constant 1 : index
    %c0_32 = arith.constant 0 : index
    %c0_33 = arith.constant 0 : index
    %48 = vector.load %arg1[%c1_31, %c0_32, %c0_33] : memref<4x8x64xbf16, #tpu.memory_space<vmem>>, vector<1x8x64xbf16>
    %49 = vector.shape_cast %48 : vector<1x8x64xbf16> to vector<8x64xbf16>
    %cst_34 = arith.constant dense<0.000000e+00> : vector<8x128xf32>
    %50 = tpu.matmul %49, %1, %cst_34 {dimension_numbers = #tpu.dot_dimension_numbers<[1], [0], [0], [1], [0, 0, 1, 1], [], []>} : vector<8x64xbf16>, vector<64x128xbf16>, vector<8x128xf32> -> vector<8x128xf32>
    %51 = vector.extract_strided_slice %21 {offsets = [1, 0], sizes = [1, 128], strides = [1, 1]} : vector<4x128xf32> to vector<1x128xf32>
    %52 = vector.broadcast %51 : vector<1x128xf32> to vector<8x128xf32>
    %53 = arith.addf %50, %52 : vector<8x128xf32>
    %54 = math.absf %53 : vector<8x128xf32>
    %cst_35 = arith.constant 0.000000e+00 : f32
    %55 = vector.broadcast %cst_35 : f32 to vector<8x128xf32>
    %56 = arith.subf %55, %54 : vector<8x128xf32>
    %57 = math.exp %56 : vector<8x128xf32>
    %cst_36 = arith.constant 1.000000e+00 : f32
    %58 = vector.broadcast %cst_36 : f32 to vector<8x128xf32>
    %59 = arith.addf %58, %57 : vector<8x128xf32>
    %60 = tpu.reciprocal %59 {approx = true} : vector<8x128xf32> -> vector<8x128xf32>
    %cst_37 = arith.constant 0.000000e+00 : f32
    %61 = vector.broadcast %cst_37 : f32 to vector<8x128xf32>
    %62 = arith.cmpf oge, %53, %61 : vector<8x128xf32>
    %cst_38 = arith.constant 1.000000e+00 : f32
    %63 = vector.broadcast %cst_38 : f32 to vector<8x128xf32>
    %64 = arith.subf %63, %60 : vector<8x128xf32>
    %65 = arith.select %62, %60, %64 : vector<8x128xi1>, vector<8x128xf32>
    %cst_39 = arith.constant 0.000000e+00 : f32
    %cst_40 = arith.constant 1.000000e+00 : f32
    %66 = vector.broadcast %cst_39 : f32 to vector<8x128xf32>
    %67 = arith.maximumf %66, %65 : vector<8x128xf32>
    %68 = vector.broadcast %cst_40 : f32 to vector<8x128xf32>
    %69 = arith.minimumf %68, %67 : vector<8x128xf32>
    %70 = arith.truncf %69 : vector<8x128xf32> to vector<8x128xbf16>
    %c1_41 = arith.constant 1 : index
    %c0_42 = arith.constant 0 : index
    %c0_43 = arith.constant 0 : index
    %71 = vector.load %arg8[%c1_41, %c0_42, %c0_43] : memref<4x8x128xbf16, #tpu.memory_space<vmem>>, vector<1x8x128xbf16>
    %72 = vector.shape_cast %71 : vector<1x8x128xbf16> to vector<8x128xbf16>
    %73 = vector.shape_cast %70 : vector<8x128xbf16> to vector<1x8x128xbf16>
    tpu.vector_store %arg8[%c1_41, %c0_42, %c0_43], %73 {strides = array<i32>} : memref<4x8x128xbf16, #tpu.memory_space<vmem>>, vector<1x8x128xbf16>,
    %c2_44 = arith.constant 2 : index
    %c0_45 = arith.constant 0 : index
    %c0_46 = arith.constant 0 : index
    %74 = vector.load %arg1[%c2_44, %c0_45, %c0_46] : memref<4x8x64xbf16, #tpu.memory_space<vmem>>, vector<1x8x64xbf16>
    %75 = vector.shape_cast %74 : vector<1x8x64xbf16> to vector<8x64xbf16>
    %cst_47 = arith.constant dense<0.000000e+00> : vector<8x128xf32>
    %76 = tpu.matmul %75, %2, %cst_47 {dimension_numbers = #tpu.dot_dimension_numbers<[1], [0], [0], [1], [0, 0, 1, 1], [], []>} : vector<8x64xbf16>, vector<64x128xbf16>, vector<8x128xf32> -> vector<8x128xf32>
    %77 = vector.extract_strided_slice %21 {offsets = [2, 0], sizes = [1, 128], strides = [1, 1]} : vector<4x128xf32> to vector<1x128xf32>
    %78 = vector.broadcast %77 : vector<1x128xf32> to vector<8x128xf32>
    %79 = arith.addf %76, %78 : vector<8x128xf32>
    %80 = math.absf %79 : vector<8x128xf32>
    %cst_48 = arith.constant 0.000000e+00 : f32
    %81 = vector.broadcast %cst_48 : f32 to vector<8x128xf32>
    %82 = arith.subf %81, %80 : vector<8x128xf32>
    %83 = math.exp %82 : vector<8x128xf32>
    %cst_49 = arith.constant 1.000000e+00 : f32
    %84 = vector.broadcast %cst_49 : f32 to vector<8x128xf32>
    %85 = arith.addf %84, %83 : vector<8x128xf32>
    %86 = tpu.reciprocal %85 {approx = true} : vector<8x128xf32> -> vector<8x128xf32>
    %cst_50 = arith.constant 0.000000e+00 : f32
    %87 = vector.broadcast %cst_50 : f32 to vector<8x128xf32>
    %88 = arith.cmpf oge, %79, %87 : vector<8x128xf32>
    %cst_51 = arith.constant 1.000000e+00 : f32
    %89 = vector.broadcast %cst_51 : f32 to vector<8x128xf32>
    %90 = arith.subf %89, %86 : vector<8x128xf32>
    %91 = arith.select %88, %86, %90 : vector<8x128xi1>, vector<8x128xf32>
    %cst_52 = arith.constant 0.000000e+00 : f32
    %cst_53 = arith.constant 1.000000e+00 : f32
    %92 = vector.broadcast %cst_52 : f32 to vector<8x128xf32>
    %93 = arith.maximumf %92, %91 : vector<8x128xf32>
    %94 = vector.broadcast %cst_53 : f32 to vector<8x128xf32>
    %95 = arith.minimumf %94, %93 : vector<8x128xf32>
    %96 = arith.truncf %95 : vector<8x128xf32> to vector<8x128xbf16>
    %c2_54 = arith.constant 2 : index
    %c0_55 = arith.constant 0 : index
    %c0_56 = arith.constant 0 : index
    %97 = vector.load %arg8[%c2_54, %c0_55, %c0_56] : memref<4x8x128xbf16, #tpu.memory_space<vmem>>, vector<1x8x128xbf16>
    %98 = vector.shape_cast %97 : vector<1x8x128xbf16> to vector<8x128xbf16>
    %99 = vector.shape_cast %96 : vector<8x128xbf16> to vector<1x8x128xbf16>
    tpu.vector_store %arg8[%c2_54, %c0_55, %c0_56], %99 {strides = array<i32>} : memref<4x8x128xbf16, #tpu.memory_space<vmem>>, vector<1x8x128xbf16>,
    %c3 = arith.constant 3 : index
    %c0_57 = arith.constant 0 : index
    %c0_58 = arith.constant 0 : index
    %100 = vector.load %arg1[%c3, %c0_57, %c0_58] : memref<4x8x64xbf16, #tpu.memory_space<vmem>>, vector<1x8x64xbf16>
    %101 = vector.shape_cast %100 : vector<1x8x64xbf16> to vector<8x64xbf16>
    %cst_59 = arith.constant dense<0.000000e+00> : vector<8x128xf32>
    %102 = tpu.matmul %101, %20, %cst_59 {dimension_numbers = #tpu.dot_dimension_numbers<[1], [0], [0], [1], [0, 0, 1, 1], [], []>} : vector<8x64xbf16>, vector<64x128xbf16>, vector<8x128xf32> -> vector<8x128xf32>
    %103 = vector.extract_strided_slice %21 {offsets = [3, 0], sizes = [1, 128], strides = [1, 1]} : vector<4x128xf32> to vector<1x128xf32>
    %104 = vector.broadcast %103 : vector<1x128xf32> to vector<8x128xf32>
    %105 = arith.addf %102, %104 : vector<8x128xf32>
    %106 = math.absf %105 : vector<8x128xf32>
    %cst_60 = arith.constant 0.000000e+00 : f32
    %107 = vector.broadcast %cst_60 : f32 to vector<8x128xf32>
    %108 = arith.subf %107, %106 : vector<8x128xf32>
    %109 = math.exp %108 : vector<8x128xf32>
    %cst_61 = arith.constant 1.000000e+00 : f32
    %110 = vector.broadcast %cst_61 : f32 to vector<8x128xf32>
    %111 = arith.addf %110, %109 : vector<8x128xf32>
    %112 = tpu.reciprocal %111 {approx = true} : vector<8x128xf32> -> vector<8x128xf32>
    %cst_62 = arith.constant 0.000000e+00 : f32
    %113 = vector.broadcast %cst_62 : f32 to vector<8x128xf32>
    %114 = arith.cmpf oge, %105, %113 : vector<8x128xf32>
    %cst_63 = arith.constant 1.000000e+00 : f32
    %115 = vector.broadcast %cst_63 : f32 to vector<8x128xf32>
    %116 = arith.subf %115, %112 : vector<8x128xf32>
    %117 = arith.select %114, %112, %116 : vector<8x128xi1>, vector<8x128xf32>
    %cst_64 = arith.constant 0.000000e+00 : f32
    %cst_65 = arith.constant 1.000000e+00 : f32
    %118 = vector.broadcast %cst_64 : f32 to vector<8x128xf32>
    %119 = arith.maximumf %118, %117 : vector<8x128xf32>
    %120 = vector.broadcast %cst_65 : f32 to vector<8x128xf32>
    %121 = arith.minimumf %120, %119 : vector<8x128xf32>
    %122 = arith.truncf %121 : vector<8x128xf32> to vector<8x128xbf16>
    %c3_66 = arith.constant 3 : index
    %c0_67 = arith.constant 0 : index
    %c0_68 = arith.constant 0 : index
    %123 = vector.load %arg8[%c3_66, %c0_67, %c0_68] : memref<4x8x128xbf16, #tpu.memory_space<vmem>>, vector<1x8x128xbf16>
    %124 = vector.shape_cast %123 : vector<1x8x128xbf16> to vector<8x128xbf16>
    %125 = vector.shape_cast %122 : vector<8x128xbf16> to vector<1x8x128xbf16>
    tpu.vector_store %arg8[%c3_66, %c0_67, %c0_68], %125 {strides = array<i32>} : memref<4x8x128xbf16, #tpu.memory_space<vmem>>, vector<1x8x128xbf16>,
    return
  }
  func.func @transform_0(%arg0: i32) -> (i32, i32, i32) {
    %c0_i32 = arith.constant 0 : i32
    %c0_i32_0 = arith.constant 0 : i32
    %c0_i32_1 = arith.constant 0 : i32
    %c0_i32_2 = arith.constant 0 : i32
    return %c0_i32, %c0_i32_0, %c0_i32_1 : i32, i32, i32
  }
  func.func @transform_1(%arg0: i32) -> (i32, i32) {
    %c0_i32 = arith.constant 0 : i32
    %c0_i32_0 = arith.constant 0 : i32
    return %c0_i32, %arg0 : i32, i32
  }
  func.func @transform_2(%arg0: i32) -> (i32, i32) {
    %c0_i32 = arith.constant 0 : i32
    %c0_i32_0 = arith.constant 0 : i32
    return %c0_i32, %arg0 : i32, i32
  }
  func.func @transform_3(%arg0: i32) -> (i32, i32) {
    %c0_i32 = arith.constant 0 : i32
    %c0_i32_0 = arith.constant 0 : i32
    return %c0_i32, %arg0 : i32, i32
  }
  func.func @transform_4(%arg0: i32) -> (i32, i32, i32) {
    %c0_i32 = arith.constant 0 : i32
    %c0_i32_0 = arith.constant 0 : i32
    %c0_i32_1 = arith.constant 0 : i32
    %c0_i32_2 = arith.constant 0 : i32
    return %c0_i32, %c0_i32_0, %c0_i32_1 : i32, i32, i32
  }
  func.func @transform_5(%arg0: i32) -> (i32, i32) {
    %c0_i32 = arith.constant 0 : i32
    %c0_i32_0 = arith.constant 0 : i32
    %c0_i32_1 = arith.constant 0 : i32
    return %c0_i32, %c0_i32_0 : i32, i32
  }
  func.func @transform_6(%arg0: i32) -> (i32, i32) {
    %c0_i32 = arith.constant 0 : i32
    %c0_i32_0 = arith.constant 0 : i32
    return %c0_i32, %arg0 : i32, i32
  }
  func.func @transform_7(%arg0: i32) -> (i32, i32, i32) {
    %c0_i32 = arith.constant 0 : i32
    %c0_i32_0 = arith.constant 0 : i32
    %c0_i32_1 = arith.constant 0 : i32
    return %c0_i32, %c0_i32_0, %arg0 : i32, i32, i32
  }
}

</mosaic_0001>

<bundles_post_ra>
// kernel: moci_forward.3
= control target key start
LH: loop header
LB: loop body
LE: loop exit
PB: predicated region body
PF: predicated region fallthrough
CT: control target
= control target key end

     0   :  { %v1071_v1 = vmov 0   ;;  %v1072_v3 = vmov 0.0   ;;  %vm1073_vm0 = vmmov 0   ;;  %vm112_vm1 = vcmask 523264   ;;  %s1341_s2 = inlined_call_operand.vmem [shape: bf16[64,128], index: 2, kind: input, shape index: {}]   ;;  %s1342_s4 = inlined_call_operand.vmem [shape: bf16[3,64,64], index: 4, kind: input, shape index: {}]   ;;  %s1343_s1 = inlined_call_operand.vmem [shape: bf16[64,128], index: 1, kind: input, shape index: {}]   ;;  %s1344_s3 = inlined_call_operand.vmem [shape: bf16[64,128], index: 3, kind: input, shape index: {}]   ;;  %s1345_s5 = inlined_call_operand.vmem [shape: f32[64,1], index: 5, kind: input, shape index: {}]   ;;  %s1346_s0 = inlined_call_operand.vmem [shape: bf16[4,8,64], index: 0, kind: input, shape index: {}]   ;;  %s1347_s6 = inlined_call_operand.vmem [shape: f32[4,128], index: 6, kind: input, shape index: {}]   ;;  %s1348_s7 = inlined_call_operand.vmem [shape: bf16[4,8,128], index: 7, kind: output, shape index: {}]  }
   0x1   :  { %v1117_v0 = vld [vmem:[%s1341_s2] sm:$0xff]   ;;  %1009 = vset.pattern.permute.xlu0 %v1071_v1  ;;  %1010 = vset.pattern.permute.xlu1 %v1071_v1  ;;  %v1122_v2 = vld [vmem:[%s1341_s2 + $0x8] sm:$0xff]   ;;  %v1132_v4 = vld [vmem:[%s1341_s2 + $0x10] sm:$0xff]   ;;  %v535_v37 = vlaneseq }
   0x2   :  { %942 = vmatprep.subr.bf16.mxu1 %v1072_v3  ;;  %950 = vmatprep.mubr.msk.bf16.mxu1 %vm1073_vm0, %v1072_v3  ;;  %v1015_v5 = vld [vmem:[%s1342_s4 + $0x20] sm:$0xff]   ;;  %v1149_v7 = vld [vmem:[%s1341_s2 + $0x18] sm:$0xff]   ;;  %v1154_v8 = vld [vmem:[%s1343_s1 + $0x8] sm:$0xff]  }
   0x3   :  { %894 = vmatprep.subr.bf16.mxu0 %v1117_v0  ;;  %902 = vmatprep.mubr.msk.bf16.mxu0 %vm112_vm1, %v1015_v5  ;;  %v1142_v6 = vld [vmem:[%s1343_s1] sm:$0xff]   ;;  %v1163_v9 = vld [vmem:[%s1343_s1 + $0x10] sm:$0xff]   ;;  %v1016_v10 = vld [vmem:[%s1342_s4 + $0x28] sm:$0xff]   ;;  %v1295_v38 = vshrl.u32 %v535_v37, 7 }
   0x4   :  { %895 = vmatpush3.bf16.msra.mxu0 %v1117_v0  ;;  %943 = vmatpush3.bf16.msra.mxu1 %v1142_v6  ;;  %v1019_v11 = vld [vmem:[%s1342_s4 + $0x30] sm:$0xff]   ;;  %v1178_v12 = vld [vmem:[%s1343_s1 + $0x18] sm:$0xff]   ;;  %v449_v13 = vld [vmem:[%s1345_s5] sm:$0xff] }
   0x5   :  { %896 = vmatprep.subr.bf16.mxu0 %v1122_v2  ;;  %944 = vmatprep.subr.bf16.mxu1 %v1072_v3  ;;  %v451_v14 = vld [vmem:[%s1345_s5 + $0x10] sm:$0xff]  ;;  %v1020_v15 = vld [vmem:[%s1342_s4 + $0x38] sm:$0xff]   ;;  %v1023_v16 = vld [vmem:[%s1342_s4] sm:$0xff]   ;;  %v537_v39 = vsub.s32 0, %v1295_v38  ;;  %v599_v50 = vsub.s32 1, %v1295_v38 }
   0x6   :  { %459 = vperm.xlu0 %1009, %v449_v13   ;;  %469 = vperm.xlu1 %1010, %v451_v14   ;;  %v450_v17 = vld [vmem:[%s1345_s5 + $0x8] sm:$0xff]  ;;  %v534_v18 = vld [vmem:[%s1346_s0] sm:$0xf]  ;;  %v452_v19 = vld [vmem:[%s1345_s5 + $0x18] sm:$0xff] }
   0x7   :  { %v453_v20 = vld [vmem:[%s1345_s5 + $0x20] sm:$0xff]  ;;  %v454_v22 = vld [vmem:[%s1345_s5 + $0x28] sm:$0xff]  ;;  %v1027_v24 = vld [vmem:[%s1342_s4 + $0x10] sm:$0xff]  }
   0x8   :  { %897 = vmatpush3.bf16.msra.mxu0 %v1122_v2  ;;  %945 = vmatpush3.bf16.msra.mxu1 %v1154_v8  ;;  %v1025_v21 = vld [vmem:[%s1344_s3] sm:$0xff]   ;;  %v1024_v23 = vld [vmem:[%s1342_s4 + $0x8] sm:$0xff]   ;;  %v455_v25 = vld [vmem:[%s1345_s5 + $0x30] sm:$0xff] }
   0x9   :  { %898 = vmatprep.subr.bf16.mxu0 %v1132_v4  ;;  %946 = vmatprep.subr.bf16.mxu1 %v1072_v3  ;;  %v1026_v26 = vld [vmem:[%s1344_s3 + $0x8] sm:$0xff]   ;;  %v456_v27 = vld [vmem:[%s1345_s5 + $0x38] sm:$0xff]  ;;  %v1029_v28 = vld [vmem:[%s1344_s3 + $0x10] sm:$0xff]  }
   0xa   :  { %464 = vperm.xlu0 %1009, %v450_v17   ;;  %474 = vperm.xlu1 %1010, %v452_v19   ;;  %v1028_v29 = vld [vmem:[%s1342_s4 + $0x18] sm:$0xff]   ;;  %v1031_v30 = vld [vmem:[%s1342_s4 + $0x40] sm:$0xff]   ;;  %v1032_v33 = vld [vmem:[%s1342_s4 + $0x48] sm:$0xff]  }
   0xb   :  { %v1030_v31 = vld [vmem:[%s1344_s3 + $0x18] sm:$0xff]   ;;  %v841_v32 = vld [vmem:[%s1346_s0 + $0x4] sm:$0xf]  ;;  %v1033_v34 = vld [vmem:[%s1342_s4 + $0x50] sm:$0xff]  }
   0xc   :  { %899 = vmatpush3.bf16.msra.mxu0 %v1132_v4  ;;  %947 = vmatpush3.bf16.msra.mxu1 %v1163_v9  ;;  %v1034_v35 = vld [vmem:[%s1342_s4 + $0x58] sm:$0xff]   ;;  %v844_v36 = vld [vmem:[%s1346_s0 + $0x8] sm:$0xf]  ;;  %v1301_v40 = vld [vmem:[%s1347_s6] sm:$0xf] }
   0xd   :  { %900 = vmatprep.subr.bf16.mxu0 %v1149_v7  ;;  %948 = vmatprep.subr.bf16.mxu1 %v1072_v3  ;;  %v538_v41 = vrot.slane %v1301_v40, %v537_v39  ;;  %v600_v53 = vrot.slane %v1301_v40, %v599_v50 }
   0xe   :  { %479 = vperm.xlu0 %1009, %v453_v20   ;;  %484 = vperm.xlu1 %1010, %v454_v22  }
  0x10   :  { %901 = vmatpush3.bf16.msra.mxu0 %v1149_v7  ;;  %949 = vmatpush3.bf16.msra.mxu1 %v1178_v12 }
  0x11   :  { %910 = vmatprep.subr.bf16.mxu0 %v1142_v6  ;;  %954 = vmatprep.subr.bf16.mxu1 %v1072_v3 }
  0x12   :  { %489 = vperm.xlu0 %1009, %v455_v25   ;;  %494 = vperm.xlu1 %1010, %v456_v27  }
  0x13   :  { %903 = vmatmul.mubr.msk.bf16.vlgmr.msra.gmra.mrb[0].mxu0 %vm112_vm1, %v1016_v10  ;;  %951 = vmatmul.mubr.msk.bf16.vlgmr.msra.gmra.mrb[0].mxu1 %vm112_vm1, %v534_v18 }
  0x14   :  { %911 = vmatpush3.bf16.msra.mxu0 %v1142_v6  ;;  %906 = vmatprep.mubr.msk.bf16.mxu0 %vm112_vm1, %v1019_v11 }
  0x15   :  { %912 = vmatprep.subr.bf16.mxu0 %v1154_v8  ;;  %955 = vmatpush3.bf16.msra.mxu1 %v1117_v0 }
  0x16   :  { %962 = vmatprep.mubr.msk.bf16.mxu1 %vm1073_vm0, %v1072_v3  ;;  %956 = vmatprep.subr.bf16.mxu1 %v1072_v3 }
  0x18   :  { %913 = vmatpush3.bf16.msra.mxu0 %v1154_v8 }
  0x19   :  { %914 = vmatprep.subr.bf16.mxu0 %v1163_v9  ;;  %957 = vmatpush3.bf16.msra.mxu1 %v1122_v2 }
  0x1a   :  { %958 = vmatprep.subr.bf16.mxu1 %v1072_v3 }
  0x1b   :  { %907 = vmatmul.mubr.msk.bf16.gmra.mrb[4].mxu0 %vm112_vm1, %v1020_v15 }
  0x1c   :  { %915 = vmatpush3.bf16.msra.mxu0 %v1163_v9  ;;  %918 = vmatprep.mubr.msk.bf16.mxu0 %vm112_vm1, %v1023_v16 }
  0x1d   :  { %916 = vmatprep.subr.bf16.mxu0 %v1178_v12  ;;  %959 = vmatpush3.bf16.msra.mxu1 %v1132_v4 }
  0x1e   :  { %960 = vmatprep.subr.bf16.mxu1 %v1072_v3 }
  0x20   :  { %917 = vmatpush3.bf16.msra.mxu0 %v1178_v12 }
  0x21   :  { %926 = vmatprep.subr.bf16.mxu0 %v1025_v21  ;;  %961 = vmatpush3.bf16.msra.mxu1 %v1149_v7 }
  0x22   :  { %966 = vmatprep.subr.bf16.mxu1 %v1072_v3 }
  0x23   :  { %919 = vmatmul.mubr.msk.bf16.vlgmr.msra.gmra.mrb[0].mxu0 %vm112_vm1, %v1024_v23  ;;  %v515_v23 = vunpack.c.l.bf16 %v1154_v8 }
  0x24   :  { %927 = vmatpush3.bf16.msra.mxu0 %v1025_v21  ;;  %922 = vmatprep.mubr.msk.bf16.mxu0 %vm112_vm1, %v1027_v24 }
  0x25   :  { %928 = vmatprep.subr.bf16.mxu0 %v1026_v26  ;;  %963 = vmatmul.mubr.msk.bf16.vlgmr.msra.gmra.mrb[4].mxu1 %vm112_vm1, %v841_v32  ;;  %v516_v32 = vunpack.c.h.bf16 %v1154_v8  ;;  %v519_v8 = vunpack.c.l.bf16 %v1178_v12 }
  0x26   :  { %967 = vmatpush3.bf16.msra.mxu1 %v1025_v21  ;;  %974 = vmatprep.mubr.msk.bf16.mxu1 %vm1073_vm0, %v1072_v3 }
  0x27   :  { %968 = vmatprep.subr.bf16.mxu1 %v1072_v3 }
  0x28   :  { %929 = vmatpush3.bf16.msra.mxu0 %v1026_v26 }
  0x29   :  { %930 = vmatprep.subr.bf16.mxu0 %v1029_v28 }
  0x2a   :  { %969 = vmatpush3.bf16.msra.mxu1 %v1026_v26 }
  0x2b   :  { %923 = vmatmul.mubr.msk.bf16.gmra.mrb[4].mxu0 %vm112_vm1, %v1028_v29  ;;  %970 = vmatprep.subr.bf16.mxu1 %v1072_v3 }
  0x2c   :  { %931 = vmatpush3.bf16.msra.mxu0 %v1029_v28  ;;  %934 = vmatprep.mubr.msk.bf16.mxu0 %vm112_vm1, %v1031_v30 }
  0x2d   :  { %932 = vmatprep.subr.bf16.mxu0 %v1030_v31 }
  0x2e   :  { %971 = vmatpush3.bf16.msra.mxu1 %v1029_v28  ;;  %v513_v28 = vunpack.c.l.bf16 %v1142_v6 }
  0x2f   :  { %972 = vmatprep.subr.bf16.mxu1 %v1072_v3 }
  0x30   :  { %933 = vmatpush3.bf16.msra.mxu0 %v1030_v31 }
  0x31   :  { %978 = vmatprep.subr.bf16.mxu0 %v1072_v3 }
  0x32   :  { %973 = vmatpush3.bf16.msra.mxu1 %v1030_v31 }
  0x33   :  { %935 = vmatmul.mubr.msk.bf16.vlgmr.msra.gmra.mrb[0].mxu0 %vm112_vm1, %v1032_v33 }
  0x34   :  { %938 = vmatprep.mubr.msk.bf16.mxu0 %vm112_vm1, %v1033_v34 }
  0x35   :  { %975 = vmatmul.mubr.msk.bf16.vlgmr.msra.gmra.mrb[8].mxu1 %vm112_vm1, %v844_v36 }
  0x3b   :  { %939 = vmatmul.mubr.msk.bf16.gmra.mrb[4].mxu0 %vm112_vm1, %v1034_v35  ;;  %v514_v35 = vunpack.c.h.bf16 %v1142_v6 }
  0x3c   :  { %986 = vmatprep.mubr.msk.bf16.mxu0 %vm1073_vm0, %v1072_v3 }
  0x85   :  { %v460_v51 = vpop.permute.xlu0 %459  ;;  %v470_v52 = vpop.permute.xlu1 %469 }
  0x89   :  { %v465_v57 = vpop.permute.xlu0 %464  ;;  %v475_v61 = vpop.permute.xlu1 %474 }
  0x8d   :  { %v480_v5 = vpop.permute.xlu0 %479  ;;  %v485_v15 = vpop.permute.xlu1 %484 }
  0x91   :  { %v490_v18 = vpop.permute.xlu0 %489  ;;  %v495_v24 = vpop.permute.xlu1 %494 }
  0xe6   :  { %v576_v42 = vpop.f32.mrb[0].mxu1 }
  0xe7   :  { %v577_v43 = vadd.f32 %v576_v42, %v538_v41  ;;  %v952_v44 = vpop.f32.mrb[1].mxu1 }
  0xe8   :  { %v579_v45 = vpop.f32.mrb[2].mxu1 }
  0xe9   :  { %v582_v46 = vand.u32 2147483647, %v577_v43  ;;  %v953_v47 = vpop.f32.mrb[3].mxu1  ;;  %vm588_vm2 = vcmp.ge.f32.partialorder %v577_v43, 0.0 }
  0xeb   :  { %v583_v48 = vsub.f32 0.0, %v582_v46 }
  0xed   :  { %v584_v49 = vmul.f32 1.442695, %v583_v48 }
  0xef   :  { %1039 = vpow2.f32 %v584_v49  ;;  %v517_v49 = vunpack.c.l.bf16 %v1163_v9 }
  0xf8   :  { %v638_v56 = vpop.f32.mrb[4].mxu1 }
  0xf9   :  { %v1040_v54 = vpop.eup %1039  ;;  %v1306_v58 = vadd.f32 %v638_v56, %v600_v53  ;;  %v964_v59 = vpop.f32.mrb[5].mxu1  ;;  %v518_v53 = vunpack.c.h.bf16 %v1163_v9 }
  0xfa   :  { %v586_v55 = vadd.f32 1.0, %v1040_v54  ;;  %v641_v60 = vpop.f32.mrb[6].mxu1 }
  0xfb   :  { %v644_v62 = vand.u32 2147483647, %v1306_v58  ;;  %v965_v63 = vpop.f32.mrb[7].mxu1  ;;  %vm650_vm3 = vcmp.ge.f32.partialorder %v1306_v58, 0.0 }
  0xfc   :  { %1041 = vrcp.f32 %v586_v55 }
  0xfd   :  { %v645_v1 = vsub.f32 0.0, %v644_v62 }
  0xff   :  { %v646_v14 = vmul.f32 1.442695, %v645_v1 }
 0x106   :  { %v936_v0 = vpop.f32.mrb[0].mxu0  ;;  %v1042_v17 = vpop.eup %1041 }
 0x107   :  { %v499_v2 = vadd.f32 %v936_v0, %v470_v52  ;;  %v410_v4 = vpop.f32.mrb[1].mxu0  ;;  %v589_v20 = vsub.f32 1.0, %v1042_v17  ;;  %v847_v0 = vld [vmem:[%s1346_s0 + $0xc] sm:$0xf] }
 0x108   :  { %v497_v7 = vadd.f32 %v460_v51, %v410_v4  ;;  %v937_v10 = vpop.f32.mrb[2].mxu0  ;;  %v520_v51 = vunpack.c.h.bf16 %v1178_v12 }
 0x109   :  { %1043 = vtanh.f32 %v499_v2  ;;  %v500_v11 = vadd.f32 %v937_v10, %v475_v61  ;;  %v413_v13 = vpop.f32.mrb[3].mxu0  ;;  %v590_v27 = vsel %vm588_vm2, %v1042_v17, %v589_v20 }
 0x10a   :  { %1045 = vtanh.f32 %v497_v7  ;;  %v498_v16 = vadd.f32 %v465_v57, %v413_v13  ;;  %v591_v31 = vmax.f32 %v590_v27, 0.0  ;;  %v701_v7 = vpop.f32.mrb[8].mxu1 }
 0x10b   :  { %1047 = vtanh.f32 %v500_v11  ;;  %v976_v11 = vpop.f32.mrb[9].mxu1 }
 0x10c   :  { %1049 = vtanh.f32 %v498_v16  ;;  %v592_v36 = vmin.f32 %v591_v31, 1.0  ;;  %v704_v13 = vpop.f32.mrb[10].mxu1 }
 0x10d   :  { %1051 = vpow2.f32 %v646_v14 }
 0x10e   :  { %v940_v19 = vpop.f32.mrb[4].mxu0  ;;  %v593_v43 = vpack.c.bf16 %v592_v36, %v592_v36 }
 0x10f   :  { %v503_v21 = vadd.f32 %v940_v19, %v490_v18  ;;  %v426_v22 = vpop.f32.mrb[5].mxu0 }
 0x110   :  { %v501_v25 = vadd.f32 %v480_v5, %v426_v22  ;;  %v941_v26 = vpop.f32.mrb[6].mxu0  ;;  %594 = vst [vmem:[%s1348_s7] sm:$0xf] %v593_v43 }
 0x111   :  { %1053 = vtanh.f32 %v503_v21  ;;  %v504_v29 = vadd.f32 %v941_v26, %v495_v24  ;;  %v429_v30 = vpop.f32.mrb[7].mxu0  ;;  %v725_v26 = vsub.s32 3, %v1295_v38 }
 0x112   :  { %1055 = vtanh.f32 %v501_v25  ;;  %v502_v33 = vadd.f32 %v485_v15, %v429_v30  ;;  %v977_v15 = vpop.f32.mrb[11].mxu1 }
 0x113   :  { %v1044_v34 = vpop.eup %1043  ;;  %1057 = vtanh.f32 %v504_v29  ;;  %v726_v27 = vrot.slane %v1301_v40, %v725_v26 }
 0x114   :  { %v1046_v37 = vpop.eup %1045  ;;  %1059 = vtanh.f32 %v502_v33  ;;  %v523_v39 = vadd.f32 %v1044_v34, %v515_v23 }
 0x115   :  { %v1048_v41 = vpop.eup %1047  ;;  %v521_v42 = vadd.f32 %v1046_v37, %v513_v28 }
 0x116   :  { %v1050_v44 = vpop.eup %1049  ;;  %v524_v45 = vadd.f32 %v1048_v41, %v516_v32 }
 0x117   :  { %v1052_v46 = vpop.eup %1051  ;;  %v522_v47 = vadd.f32 %v1050_v44, %v514_v35 }
 0x118   :  { %v530_v48 = vpack.c.bf16 %v524_v45, %v523_v39  ;;  %v648_v6 = vadd.f32 1.0, %v1052_v46 }
 0x119   :  { %v529_v50 = vpack.c.bf16 %v522_v47, %v521_v42 }
 0x11a   :  { %1061 = vrcp.f32 %v648_v6 }
 0x11b   :  { %v1054_v52 = vpop.eup %1053  ;;  %979 = vmatpush3.bf16.msra.mxu0 %v529_v50 }
 0x11c   :  { %v1056_v54 = vpop.eup %1055  ;;  %980 = vmatprep.subr.bf16.mxu0 %v1072_v3  ;;  %v527_v55 = vadd.f32 %v1054_v52, %v519_v8 }
 0x11d   :  { %v1058_v56 = vpop.eup %1057  ;;  %v525_v57 = vadd.f32 %v1056_v54, %v517_v49 }
 0x11e   :  { %v1060_v59 = vpop.eup %1059  ;;  %v528_v60 = vadd.f32 %v1058_v56, %v520_v51 }
 0x11f   :  { %981 = vmatpush3.bf16.msra.mxu0 %v530_v48  ;;  %v526_v61 = vadd.f32 %v1060_v59, %v518_v53 }
 0x120   :  { %982 = vmatprep.subr.bf16.mxu0 %v1072_v3  ;;  %v532_v62 = vpack.c.bf16 %v528_v60, %v527_v55 }
 0x121   :  { %v531_v63 = vpack.c.bf16 %v526_v61, %v525_v57 }
 0x123   :  { %983 = vmatpush3.bf16.msra.mxu0 %v531_v63 }
 0x124   :  { %v1062_v12 = vpop.eup %1061  ;;  %984 = vmatprep.subr.bf16.mxu0 %v1072_v3  ;;  %v662_v3 = vsub.s32 2, %v1295_v38 }
 0x125   :  { %v651_v9 = vsub.f32 1.0, %v1062_v12 }
 0x126   :  { %v663_v58 = vrot.slane %v1301_v40, %v662_v3 }
 0x127   :  { %985 = vmatpush3.bf16.msra.mxu0 %v532_v62  ;;  %v652_v1 = vsel %vm650_vm3, %v1062_v12, %v651_v9 }
 0x128   :  { %v653_v2 = vmax.f32 %v652_v1, 0.0  ;;  %v702_v10 = vadd.f32 %v701_v7, %v663_v58 }
 0x12a   :  { %987 = vmatmul.mubr.msk.bf16.vlgmr.msra.gmra.mrb[8].mxu0 %vm112_vm1, %v847_v0  ;;  %v654_v4 = vmin.f32 %v653_v2, 1.0  ;;  %v707_v14 = vand.u32 2147483647, %v702_v10  ;;  %vm713_vm4 = vcmp.ge.f32.partialorder %v702_v10, 0.0 }
 0x12c   :  { %v655_v5 = vpack.c.bf16 %v654_v4, %v654_v4  ;;  %v708_v16 = vsub.f32 0.0, %v707_v14 }
 0x12e   :  { %843 = vst [vmem:[%s1348_s7 + $0x4] sm:$0xf] %v655_v5  ;;  %v709_v17 = vmul.f32 1.442695, %v708_v16 }
 0x130   :  { %1063 = vpow2.f32 %v709_v17 }
 0x13a   :  { %v1064_v18 = vpop.eup %1063 }
 0x13b   :  { %v711_v19 = vadd.f32 1.0, %v1064_v18 }
 0x13d   :  { %1065 = vrcp.f32 %v711_v19 }
 0x147   :  { %v1066_v20 = vpop.eup %1065 }
 0x148   :  { %v714_v21 = vsub.f32 1.0, %v1066_v20 }
 0x14a   :  { %v715_v22 = vsel %vm713_vm4, %v1066_v20, %v714_v21 }
 0x14b   :  { %v716_v23 = vmax.f32 %v715_v22, 0.0 }
 0x14d   :  { %v717_v24 = vmin.f32 %v716_v23, 1.0 }
 0x14f   :  { %v718_v25 = vpack.c.bf16 %v717_v24, %v717_v24 }
 0x151   :  { %846 = vst [vmem:[%s1348_s7 + $0x8] sm:$0xf] %v718_v25 }
 0x1fd   :  { %v764_v28 = vpop.f32.mrb[8].mxu0 }
 0x1fe   :  { %v765_v29 = vadd.f32 %v764_v28, %v726_v27  ;;  %v988_v30 = vpop.f32.mrb[9].mxu0 }
 0x1ff   :  { %v767_v31 = vpop.f32.mrb[10].mxu0 }
 0x200   :  { %v770_v32 = vand.u32 2147483647, %v765_v29  ;;  %v989_v33 = vpop.f32.mrb[11].mxu0  ;;  %vm776_vm5 = vcmp.ge.f32.partialorder %v765_v29, 0.0 }
 0x202   :  { %v771_v34 = vsub.f32 0.0, %v770_v32 }
 0x204   :  { %v772_v35 = vmul.f32 1.442695, %v771_v34 }
 0x206   :  { %1067 = vpow2.f32 %v772_v35 }
 0x210   :  { %v1068_v36 = vpop.eup %1067 }
 0x211   :  { %v774_v37 = vadd.f32 1.0, %v1068_v36 }
 0x213   :  { %1069 = vrcp.f32 %v774_v37 }
 0x21d   :  { %v1070_v39 = vpop.eup %1069 }
 0x21e   :  { %v777_v41 = vsub.f32 1.0, %v1070_v39 }
 0x220   :  { %v778_v42 = vsel %vm776_vm5, %v1070_v39, %v777_v41 }
 0x221   :  { %v779_v43 = vmax.f32 %v778_v42, 0.0 }
 0x223   :  { %v780_v38 = vmin.f32 %v779_v43, 1.0 }
 0x225   :  { %v781_v44 = vpack.c.bf16 %v780_v38, %v780_v38 }
 0x227   :  { %849 = vst [vmem:[%s1348_s7 + $0xc] sm:$0xf] %v781_v44 }

// kernel: moci_forward.2
= control target key start
LH: loop header
LB: loop body
LE: loop exit
PB: predicated region body
PF: predicated region fallthrough
CT: control target
= control target key end

     0   :  { %s2940_s29 = smov 0   ;;  %s3296_s0 = inlined_call_operand.vmem [shape: bf16[3,8,64], index: 0, kind: input, shape index: {}]   ;;  %s3297_s1 = inlined_call_operand.vmem [shape: bf16[3,8,64], index: 1, kind: input, shape index: {}]   ;;  %s3298_s2 = inlined_call_operand.vmem [shape: bf16[3,64,64], index: 2, kind: input, shape index: {}]   ;;  %s3299_s3 = inlined_call_operand.vmem [shape: f32[1,64], index: 3, kind: input, shape index: {}]   ;;  %s3300_s4 = inlined_call_operand.vmem [shape: bf16[64,64], index: 4, kind: input, shape index: {}]   ;;  %s3301_s5 = inlined_call_operand.vmem [shape: f32[1,64], index: 5, kind: input, shape index: {}]   ;;  %s3302_s6 = inlined_call_operand.vmem [shape: bf16[4,64,64], index: 6, kind: input, shape index: {}]   ;;  %s3303_s7 = inlined_call_operand.vmem [shape: bf16[4,64,64], index: 7, kind: input, shape index: {}]   ;;  %s3304_s8 = inlined_call_operand.vmem [shape: f32[4,1,64], index: 8, kind: input, shape index: {}]   ;;  %s3305_s9 = inlined_call_operand.vmem [shape: bf16[4,64,768], index: 9, kind: input, shape index: {}]   ;;  %s3306_s10 = inlined_call_operand.vmem [shape: bf16[4,64,768], index: 10, kind: input, shape index: {}]   ;;  %s3307_s11 = inlined_call_operand.vmem [shape: f32[4,1,768], index: 11, kind: input, shape index: {}]   ;;  %s3308_s12 = inlined_call_operand.vmem [shape: bf16[4,768,64], index: 12, kind: input, shape index: {}]   ;;  %s3309_s13 = inlined_call_operand.vmem [shape: f32[4,1,64], index: 13, kind: input, shape index: {}]   ;;  %s3310_s14 = inlined_call_operand.vmem [shape: bf16[4,8,64], index: 14, kind: output, shape index: {}]  }
   0x1 LB: > { %s2946_s30 = sadd.s32 4294967295, %s2860_s29   ;;  %p2357_p0 = scmp.ge.s32.totalorder %s2860_s29, 1  ;;  %s2860_s29 = sphi %s2940_s29, %s24_s29  }
   0x2   : > { %p477_p1 = scmp.lt.s32.totalorder %s2860_s29, 5 }
   0x4   : > { %p478_p2 = pnand %p2357_p0, %p477_p1 }
   0x5   : > { %v2708_v0 = vld [vmem:[%s3298_s2 + $0x20] sm:$0xff] (!%p478_p2)   ;;  %v2862_v1 = vmov (!%p478_p2), 0.0   ;;  %v2709_v2 = vld [vmem:[%s3298_s2 + $0x28] sm:$0xff] (!%p478_p2)   ;;  %vm2863_vm0 = vmmov (!%p478_p2), 0   ;;  %v2710_v3 = vld [vmem:[%s3298_s2 + $0x30] sm:$0xff] (!%p478_p2)   ;;  %vm643_vm1 = vcmask (!%p478_p2), 523264  }
   0x6   : > { %481 = sbr.rel (%p478_p2) target bundleno = 969 (0x3c9), region = 76  ;;  %2622 = vmatprep.subr.bf16.mxu1 (!%p478_p2), %v2862_v1  ;;  %2646 = vmatprep.subr.bf16.mxu0 (!%p478_p2), %v2862_v1  ;;  %v2712_v4 = vld [vmem:[%s3298_s2 + $0x40] sm:$0xff] (!%p478_p2)   ;;  %v2714_v5 = vld [vmem:[%s3298_s2 + $0x48] sm:$0xff] (!%p478_p2)   ;;  %v2711_v6 = vld [vmem:[%s3298_s2 + $0x38] sm:$0xff] (!%p478_p2)   ;;  %p927_p3 = scmp.eq.s32.totalorder (!%p478_p2), %s2946_s30, 1  ;;  %vm2220_vm2 = vcmask (!%p478_p2), 519168  }
   0x7   : > { %2623 = vmatpush3.bf16.msra.mxu1 (!%p478_p2), %v2708_v0  ;;  %2630 = vmatprep.mubr.msk.bf16.mxu1 (!%p478_p2), %vm2863_vm0, %v2862_v1  ;;  %v2716_v7 = vld [vmem:[%s3298_s2 + $0x50] sm:$0xff] (!%p478_p2)   ;;  %v2985_v8 = vld [vmem:[%s3296_s0 + $0x4] sm:$0xf] (!%p478_p2)  ;;  %v2718_v10 = vld [vmem:[%s3298_s2 + $0x58] sm:$0xff] (!%p478_p2)   ;;  %p924_p4 = scmp.eq.s32.totalorder (!%p478_p2), %s2946_s30, 0  ;;  %p930_p5 = scmp.eq.s32.totalorder (!%p478_p2), %s2946_s30, 2 }
   0x8   : > { %2624 = vmatprep.subr.bf16.mxu1 (!%p478_p2), %v2862_v1  ;;  %2654 = vmatprep.mubr.msk.bf16.mxu0 (!%p478_p2), %vm2863_vm0, %v2862_v1  ;;  %v2713_v9 = vld [vmem:[%s3298_s2] sm:$0xff] (!%p478_p2)   ;;  %v2715_v11 = vld [vmem:[%s3298_s2 + $0x8] sm:$0xff] (!%p478_p2)   ;;  %v2717_v13 = vld [vmem:[%s3298_s2 + $0x10] sm:$0xff] (!%p478_p2)   ;;  %p552_p6 = scmp.lt.s32.totalorder (!%p478_p2), %s2946_s30, 3  ;;  %v938_v24 = vunpack.c.l.bf16 (!%p478_p2), %v2985_v8  ;;  %p933_p7 = scmp.eq.s32.totalorder (!%p478_p2), %s2946_s30, 3 }
   0x9   : > { %2647 = vmatpush3.bf16.msra.mxu0 (!%p478_p2), %v2712_v4  ;;  %v3006_v12 = vld [vmem:[%s3296_s0 + $0x8] sm:$0xf] (!%p478_p2)  ;;  %v2719_v14 = vld [vmem:[%s3298_s2 + $0x18] sm:$0xff] (!%p478_p2)   ;;  %v3024_v15 = vld [vmem:[%s3296_s0] sm:$0xf] (!%p478_p2) }
   0xa   : > { %2648 = vmatprep.subr.bf16.mxu0 (!%p478_p2), %v2862_v1  ;;  %v2720_v16 = vld [vmem:[%s3300_s4] sm:$0xff] (!%p478_p2)   ;;  %v2721_v17 = vld [vmem:[%s3300_s4 + $0x8] sm:$0xff] (!%p478_p2)   ;;  %v2722_v18 = vld [vmem:[%s3300_s4 + $0x10] sm:$0xff] (!%p478_p2)   ;;  %v840_v26 = vunpack.c.l.bf16 (!%p478_p2), %v3024_v15  ;;  %v942_v29 = vunpack.c.l.bf16 (!%p478_p2), %v3006_v12 }
   0xb   : > { %2625 = vmatpush3.bf16.msra.mxu1 (!%p478_p2), %v2709_v2  ;;  %v2723_v19 = vld [vmem:[%s3300_s4 + $0x18] sm:$0xff] (!%p478_p2)   ;;  %v3049_v20 = vld [vmem:[%s3297_s1] sm:$0xf] (!%p478_p2)  ;;  %v2368_v53 = vld [vmem:[%s3297_s1 + $0x4] sm:$0xff] (!%p478_p2)  }
   0xc   : > { %2626 = vmatprep.subr.bf16.mxu1 (!%p478_p2), %v2862_v1  ;;  %v2401_v54 = vld [vmem:[%s3299_s3] ss:$0 sm:$0xff] (!%p478_p2)  ;;  %v952_v58 = vunpack.c.l.bf16 (!%p478_p2), %v2368_v53  ;;  %v950_v59 = vunpack.c.l.bf16 (!%p478_p2), %v3049_v20  ;;  %v955_v63 = vunpack.c.h.bf16 (!%p478_p2), %v2368_v53 }
   0xd   : > { %2649 = vmatpush3.bf16.msra.mxu0 %v2714_v5  ;;  %s928_s27 = scalar_select %p927_p3, 1, 0  ;;  %v2402_v2 = vld [vmem:[%s3301_s5] ss:$0 sm:$0xff] }
   0xe   : > { %2650 = vmatprep.subr.bf16.mxu0 %v2862_v1  ;;  %s925_s28 = scalar_select %p924_p4, 1, 0 }
   0xf   : > { %2627 = vmatpush3.bf16.msra.mxu1 %v2710_v3  ;;  %s3061_s15 = scalar_select %p552_p6, %s2946_s30, 3 }
  0x10   : > { %2628 = vmatprep.subr.bf16.mxu1 %v2862_v1  ;;  %s931_s16 = scalar_select %p930_p5, 1, 0 }
  0x11   : > { %2651 = vmatpush3.bf16.msra.mxu0 %v2716_v7  ;;  %s929_s17 = scvt.s32.f32 %s928_s27  ;;  %s2524_s18 = sshll.u32 %s3061_s15, 5 }
  0x12   : > { %2652 = vmatprep.subr.bf16.mxu0 %v2862_v1  ;;  %s926_s19 = scvt.s32.f32 %s925_s28  ;;  %s3067_s22 = scalar_lea.vmem %s3303_s7, %s2524_s18 }
  0x13   : > { %2629 = vmatpush3.bf16.msra.mxu1 %v2711_v6  ;;  %s2694_s23 = smul.u32 192, %s3061_s15  ;;  %v2724_v21 = vld [vmem:[%s3067_s22] sm:$0xff]   ;;  %s3074_s26 = scalar_lea.vmem %s3302_s6, %s2524_s18  ;;  %v2726_v23 = vld [vmem:[%s3067_s22 + $0x8] sm:$0xff]   ;;  %v939_v25 = vstv %s929_s17  ;;  %v2728_v33 = vld [vmem:[%s3067_s22 + $0x10] sm:$0xff]  }
  0x14   : > { %2634 = vmatprep.subr.bf16.mxu1 %v2862_v1  ;;  %v2725_v22 = vld [vmem:[%s3074_s26] sm:$0xff]   ;;  %s932_s27 = scvt.s32.f32 %s931_s16  ;;  %v2727_v27 = vld [vmem:[%s3074_s26 + $0x8] sm:$0xff]   ;;  %v936_v28 = vstv %s926_s19  ;;  %v940_v31 = vmul.f32 %v939_v25, %v938_v24  ;;  %v2729_v35 = vld [vmem:[%s3074_s26 + $0x10] sm:$0xff]   ;;  %s2696_s21 = smul.u32 384, %s3061_s15  ;;  %v953_v61 = vmul.f32 %v952_v58, %v939_v25 }
  0x15   : > { %2653 = vmatpush3.bf16.msra.mxu0 %v2718_v10  ;;  %s3087_s20 = scalar_lea.vmem %s3306_s10, %s2694_s23  ;;  %v937_v32 = vmul.f32 %v936_v28, %v840_v26  ;;  %v2730_v37 = vld [vmem:[%s3067_s22 + $0x18] sm:$0xff]   ;;  %s3107_s19 = scalar_lea.vmem %s3305_s9, %s2694_s23  ;;  %v951_v62 = vmul.f32 %v950_v59, %v936_v28 }
  0x16   : > { %2631 = vmatmul.mubr.msk.bf16.vlgmr.msra.gmra.mrb[0].mxu1 %vm643_vm1, %v2985_v8  ;;  %2670 = vmatprep.subr.bf16.mxu0 %v2862_v1  ;;  %v943_v30 = vstv %s932_s27  ;;  %v2731_v39 = vld [vmem:[%s3074_s26 + $0x18] sm:$0xff]   ;;  %v2737_v41 = vld [vmem:[%s3087_s20 + $0xc] ss:$24 sps:$4 sm:$0xff]   ;;  %s3114_s22 = scalar_lea.vmem %s3308_s12, %s2696_s21  ;;  %v2747_v28 = vld [vmem:[%s3087_s20 + $0x68] ss:$24 sps:$4 sm:$0xff]   ;;  %s564_s24 = scalar_lea.vmem %s3304_s8, %s3061_s15 }
  0x17   : > { %2635 = vmatpush3.bf16.msra.mxu1 %v2713_v9  ;;  %2642 = vmatprep.mubr.msk.bf16.mxu1 %vm2863_vm0, %v2862_v1  ;;  %v944_v34 = vmul.f32 %v943_v30, %v942_v29  ;;  %v941_v36 = vadd.f32 %v940_v31, %v937_v32  ;;  %v2734_v40 = vld [vmem:[%s3087_s20 + $0x4] ss:$24 sps:$4 sm:$0xff]   ;;  %s934_s18 = scalar_select %p933_p7, 1, 0  ;;  %v954_v0 = vadd.f32 %v953_v61, %v951_v62  ;;  %v2752_v29 = vld [vmem:[%s3087_s20 + $0x94] ss:$24 sps:$4 sm:$0xff]  }
  0x18   : > { %2636 = vmatprep.subr.bf16.mxu1 %v2862_v1  ;;  %2655 = vmatmul.mubr.msk.bf16.vlgmr.msra.gmra.mrb[0].mxu0 %vm643_vm1, %v3006_v12  ;;  %v2746_v24 = vld [vmem:[%s3087_s20 + $0x64] ss:$24 sps:$4 sm:$0xff]   ;;  %v2750_v31 = vld [vmem:[%s3087_s20 + $0x90] ss:$24 sps:$4 sm:$0xff]   ;;  %v2788_v53 = vld [vmem:[%s3107_s19 + $0x94] ss:$24 sps:$4 sm:$0xff]  }
  0x19   : > { %2678 = vmatprep.mubr.msk.bf16.mxu0 %vm2863_vm0, %v2862_v1  ;;  %2671 = vmatpush3.bf16.msra.mxu0 %v2724_v21  ;;  %v945_v38 = vadd.f32 %v944_v34, %v941_v36  ;;  %s935_s16 = scvt.s32.f32 %s934_s18  ;;  %v2749_v25 = vld [vmem:[%s3087_s20 + $0x6c] ss:$24 sps:$4 sm:$0xff]   ;;  %v2753_v32 = vld [vmem:[%s3087_s20 + $0x98] ss:$24 sps:$4 sm:$0xff]   ;;  %v2418_v62 = vld [vmem:[%s564_s24] ss:$0 sm:$0xff]  ;;  %s586_s18 = scalar_lea.vmem %s3309_s13, %s3061_s15 }
  0x1a   : > { %2672 = vmatprep.subr.bf16.mxu0 %v2862_v1  ;;  %v2770_v34 = vld [vmem:[%s3107_s19 + $0x4] ss:$24 sps:$4 sm:$0xff]  }
  0x1b   : > { %2637 = vmatpush3.bf16.msra.mxu1 %v2715_v11  ;;  %v946_v4 = vstv %s935_s16  ;;  %v2761_v36 = vld [vmem:[%s3087_s20 + $0x44] ss:$24 sps:$4 sm:$0xff]  }
  0x1c   : > { %2638 = vmatprep.subr.bf16.mxu1 %v2862_v1  ;;  %v2804_v58 = vld [vmem:[%s3114_s22 + $0x40] sm:$0xff]  }
  0x1d   : > { %2673 = vmatpush3.bf16.msra.mxu0 %v2726_v23  ;;  %v2741_v23 = vld [vmem:[%s3087_s20 + $0x38] ss:$24 sps:$4 sm:$0xff]  }
  0x1e   : > { %2674 = vmatprep.subr.bf16.mxu0 %v2862_v1 }
  0x1f   : > { %2639 = vmatpush3.bf16.msra.mxu1 %v2717_v13 }
  0x20   : > { %2640 = vmatprep.subr.bf16.mxu1 %v2862_v1 }
  0x21   : > { %2675 = vmatpush3.bf16.msra.mxu0 %v2728_v33  ;;  %v2758_v33 = vld [vmem:[%s3087_s20 + $0x14] ss:$24 sps:$4 sm:$0xff]  }
  0x22   : > { %2676 = vmatprep.subr.bf16.mxu0 %v2862_v1 }
  0x23   : > { %2641 = vmatpush3.bf16.msra.mxu1 %v2719_v14 }
  0x24   : > { %2658 = vmatprep.subr.bf16.mxu1 %v2862_v1 }
  0x25   : > { %2677 = vmatpush3.bf16.msra.mxu0 %v2730_v37  ;;  %v2768_v37 = vld [vmem:[%s3107_s19] ss:$24 sps:$4 sm:$0xff]  }
  0x26   : > { %2643 = vmatmul.mubr.msk.bf16.vlgmr.msra.gmra.mrb[4].mxu1 %vm643_vm1, %v3024_v15  ;;  %1288 = vmatprep.subr.bf16.mxu0 %v2734_v40  ;;  %v2738_v15 = vld [vmem:[%s3087_s20 + $0x30] ss:$24 sps:$4 sm:$0xff]   ;;  %v2764_v40 = vld [vmem:[%s3087_s20 + $0x74] ss:$24 sps:$4 sm:$0xff]  }
  0x27   : > { %2659 = vmatpush3.bf16.msra.mxu1 %v2720_v16  ;;  %2666 = vmatprep.mubr.msk.bf16.mxu1 %vm2863_vm0, %v2862_v1 }
  0x28   : > { %2660 = vmatprep.subr.bf16.mxu1 %v2862_v1 }
  0x2b   : > { %2661 = vmatpush3.bf16.msra.mxu1 %v2721_v17  ;;  %v2732_v17 = vld [vmem:[%s3087_s20] ss:$24 sps:$4 sm:$0xff]  }
  0x2c   : > { %2662 = vmatprep.subr.bf16.mxu1 %v2862_v1 }
  0x2f   : > { %2663 = vmatpush3.bf16.msra.mxu1 %v2722_v18 }
  0x30   : > { %2664 = vmatprep.subr.bf16.mxu1 %v2862_v1 }
  0x33   : > { %2665 = vmatpush3.bf16.msra.mxu1 %v2723_v19  ;;  %v2735_v19 = vld [vmem:[%s3087_s20 + $0x8] ss:$24 sps:$4 sm:$0xff]  }
  0x34   : > { %2682 = vmatprep.subr.bf16.mxu1 %v2862_v1 }
  0x36   : > { %2667 = vmatmul.mubr.msk.bf16.vlgmr.msra.gmra.mrb[8].mxu1 %vm643_vm1, %v3049_v20  ;;  %v2740_v20 = vld [vmem:[%s3087_s20 + $0x34] ss:$24 sps:$4 sm:$0xff]  }
  0x37   : > { %2690 = vmatprep.mubr.msk.bf16.mxu1 %vm2863_vm0, %v2862_v1  ;;  %2683 = vmatpush3.bf16.msra.mxu1 %v2725_v22  ;;  %v2743_v22 = vld [vmem:[%s3087_s20 + $0x3c] ss:$24 sps:$4 sm:$0xff]  }
  0x38   : > { %2684 = vmatprep.subr.bf16.mxu1 %v2862_v1 }
  0x3b   : > { %2685 = vmatpush3.bf16.msra.mxu1 %v2727_v27  ;;  %v2744_v27 = vld [vmem:[%s3087_s20 + $0x60] ss:$24 sps:$4 sm:$0xff]  }
  0x3c   : > { %2686 = vmatprep.subr.bf16.mxu1 %v2862_v1 }
  0x3f   : > { %2687 = vmatpush3.bf16.msra.mxu1 %v2729_v35  ;;  %v2756_v35 = vld [vmem:[%s3087_s20 + $0x10] ss:$24 sps:$4 sm:$0xff]  }
  0x40   : > { %2688 = vmatprep.subr.bf16.mxu1 %v2862_v1  ;;  %v956_v1 = vmul.f32 %v955_v63, %v943_v30  ;;  %v2755_v30 = vld [vmem:[%s3087_s20 + $0x9c] ss:$24 sps:$4 sm:$0xff]  }
  0x42   : > { %v957_v7 = vadd.f32 %v956_v1, %v954_v0 }
  0x43   : > { %2689 = vmatpush3.bf16.msra.mxu1 %v2731_v39  ;;  %v2759_v39 = vld [vmem:[%s3087_s20 + $0x40] ss:$24 sps:$4 sm:$0xff]  }
  0x44   : > { %1329 = vmatprep.subr.bf16.mxu1 %v2737_v41  ;;  %v2774_v41 = vld [vmem:[%s3107_s19 + $0x30] ss:$24 sps:$4 sm:$0xff]  }
  0xe9   : > { %v681_v42 = vpop.f32.mrb[0].mxu1 }
  0xea   : > { %v2632_v43 = vpop.f32.mrb[1].mxu1 }
  0xeb   : > { %v684_v44 = vpop.f32.mrb[2].mxu1  ;;  %v824_v46 = vpop.f32.mrb[0].mxu0  ;;  %v2762_v43 = vld [vmem:[%s3087_s20 + $0x70] ss:$24 sps:$4 sm:$0xff]  }
  0xec   : > { %v2633_v45 = vpop.f32.mrb[3].mxu1  ;;  %v2656_v47 = vpop.f32.mrb[1].mxu0  ;;  %v2767_v44 = vld [vmem:[%s3087_s20 + $0xa4] ss:$24 sps:$4 sm:$0xff]  }
  0xed   : > { %v827_v48 = vpop.f32.mrb[2].mxu0  ;;  %v2780_v45 = vld [vmem:[%s3107_s19 + $0x60] ss:$24 sps:$4 sm:$0xff]   ;;  %v2773_v47 = vld [vmem:[%s3107_s19 + $0xc] ss:$24 sps:$4 sm:$0xff]  }
  0xee   : > { %v2657_v49 = vpop.f32.mrb[3].mxu0  ;;  %v2771_v48 = vld [vmem:[%s3107_s19 + $0x8] ss:$24 sps:$4 sm:$0xff]  }
  0xef   : > { %v2779_v49 = vld [vmem:[%s3107_s19 + $0x3c] ss:$24 sps:$4 sm:$0xff]  }
  0xf9   : > { %v748_v50 = vpop.f32.mrb[4].mxu1 }
  0xfa   : > { %v749_v51 = vadd.f32 %v748_v50, %v681_v42  ;;  %v2644_v52 = vpop.f32.mrb[5].mxu1  ;;  %v2782_v42 = vld [vmem:[%s3107_s19 + $0x64] ss:$24 sps:$4 sm:$0xff]   ;;  %v2777_v50 = vld [vmem:[%s3107_s19 + $0x38] ss:$24 sps:$4 sm:$0xff]  }
  0xfb   : > { %v751_v55 = vpop.f32.mrb[6].mxu1  ;;  %v2783_v52 = vld [vmem:[%s3107_s19 + $0x68] ss:$24 sps:$4 sm:$0xff]  }
  0xfc   : > { %v830_v56 = vadd.f32 %v824_v46, %v749_v51  ;;  %v2645_v57 = vpop.f32.mrb[7].mxu1  ;;  %v2765_v46 = vld [vmem:[%s3087_s20 + $0xa0] ss:$24 sps:$4 sm:$0xff]   ;;  %v2785_v51 = vld [vmem:[%s3107_s19 + $0x6c] ss:$24 sps:$4 sm:$0xff]  }
  0xfd   : > { %v2791_v55 = vld [vmem:[%s3107_s19 + $0x9c] ss:$24 sps:$4 sm:$0xff]  }
  0xfe   : > { %v838_v60 = vadd.f32 %v2401_v54, %v830_v56  ;;  %v2786_v54 = vld [vmem:[%s3107_s19 + $0x90] ss:$24 sps:$4 sm:$0xff]   ;;  %v2794_v57 = vld [vmem:[%s3107_s19 + $0x14] ss:$24 sps:$4 sm:$0xff]  }
  0xff   : > { %v2789_v56 = vld [vmem:[%s3107_s19 + $0x98] ss:$24 sps:$4 sm:$0xff]  }
 0x100   : > { %2852 = vtanh.f32 %v838_v60 }
 0x109   : > { %v918_v3 = vpop.f32.mrb[8].mxu1 }
 0x10a   : > { %v2853_v5 = vpop.eup %2852  ;;  %v919_v6 = vadd.f32 %v2402_v2, %v918_v3  ;;  %v2668_v8 = vpop.f32.mrb[9].mxu1 }
 0x10b   : > { %v841_v9 = vadd.f32 %v2853_v5, %v840_v26  ;;  %v921_v10 = vpop.f32.mrb[10].mxu1  ;;  %v2864_v26 = vmov 0   ;;  %v2797_v8 = vld [vmem:[%s3107_s19 + $0x44] ss:$24 sps:$4 sm:$0xff]  }
 0x10c   : > { %v958_v11 = vmul.f32 %v946_v4, %v919_v6  ;;  %v2669_v12 = vpop.f32.mrb[11].mxu1  ;;  %v2792_v6 = vld [vmem:[%s3107_s19 + $0x10] ss:$24 sps:$4 sm:$0xff]  }
 0x10d   : > { %v947_v13 = vmul.f32 %v946_v4, %v841_v9  ;;  %v2805_v9 = vld [vmem:[%s3114_s22] sm:$0xff]   ;;  %v2808_v10 = vld [vmem:[%s3114_s22 + $0x48] sm:$0xff]  }
 0x10e   : > { %v959_v14 = vadd.f32 %v958_v11, %v957_v7  ;;  %v2795_v11 = vld [vmem:[%s3107_s19 + $0x40] ss:$24 sps:$4 sm:$0xff]   ;;  %v2800_v12 = vld [vmem:[%s3107_s19 + $0x74] ss:$24 sps:$4 sm:$0xff]  }
 0x10f   : > { %v948_v16 = vadd.f32 %v947_v13, %v945_v38  ;;  %v2776_v38 = vld [vmem:[%s3107_s19 + $0x34] ss:$24 sps:$4 sm:$0xff]  }
 0x110   : > { %v3130_v18 = vpack.c.bf16 %v959_v14, %v959_v14  ;;  %v2809_v13 = vld [vmem:[%s3114_s22 + $0x8] sm:$0xff]   ;;  %v2812_v14 = vld [vmem:[%s3114_s22 + $0x50] sm:$0xff]  }
 0x111   : > { %v949_v21 = vpack.c.bf16 %v948_v16, %v948_v16  ;;  %v2798_v16 = vld [vmem:[%s3107_s19 + $0x70] ss:$24 sps:$4 sm:$0xff]  }
 0x112   : > { %2679 = vmatmul.mubr.msk.bf16.vlgmr.msra.gmra.mrb[4].mxu0 %vm643_vm1, %v3130_v18 }
 0x113   : > { %1289 = vmatpush1.bf16.msra.mxu0 %v2732_v17  ;;  %2691 = vmatmul.mubr.msk.bf16.vlgmr.msra.gmra.mrb[12].mxu1 %vm643_vm1, %v949_v21  ;;  %v2803_v17 = vld [vmem:[%s3107_s19 + $0xa4] ss:$24 sps:$4 sm:$0xff]  }
 0x114   : > { %1330 = vmatpush1.bf16.msra.mxu1 %v2735_v19  ;;  %1290 = vmatprep.subr.bf16.mxu0 %v2740_v20  ;;  %v2816_v19 = vld [vmem:[%s3114_s22 + $0x58] sm:$0xff]  }
 0x115   : > { %1331 = vmatprep.subr.bf16.mxu1 %v2743_v22  ;;  %1320 = vmatprep.mubr.bf16.mxu0 %v2864_v26 }
 0x116   : > { %1361 = vmatprep.mubr.bf16.mxu1 %v2864_v26 }
 0x117   : > { %1291 = vmatpush1.bf16.msra.mxu0 %v2738_v15  ;;  %v2801_v15 = vld [vmem:[%s3107_s19 + $0xa0] ss:$24 sps:$4 sm:$0xff]   ;;  %s2695_s19 = smul.u32 6, %s3061_s15 }
 0x118   : > { %1332 = vmatpush1.bf16.msra.mxu1 %v2741_v23  ;;  %1292 = vmatprep.subr.bf16.mxu0 %v2746_v24 }
 0x119   : > { %1333 = vmatprep.subr.bf16.mxu1 %v2749_v25  ;;  %v2806_v25 = vld [vmem:[%s3114_s22 + $0xc0] sm:$0xff]   ;;  %s578_s26 = scalar_lea.vmem %s3307_s11, %s2695_s19 }
 0x11b   : > { %1293 = vmatpush1.bf16.msra.mxu0 %v2744_v27 }
 0x11c   : > { %1334 = vmatpush1.bf16.msra.mxu1 %v2747_v28  ;;  %1294 = vmatprep.subr.bf16.mxu0 %v2752_v29  ;;  %v2820_v29 = vld [vmem:[%s3114_s22 + $0x60] sm:$0xff]  }
 0x11d   : > { %1335 = vmatprep.subr.bf16.mxu1 %v2755_v30 }
 0x11f   : > { %1295 = vmatpush1.bf16.msra.mxu0 %v2750_v31  ;;  %v2807_v31 = vld [vmem:[%s3114_s22 + $0x80] sm:$0xff]  }
 0x120   : > { %1336 = vmatpush1.bf16.msra.mxu1 %v2753_v32  ;;  %1370 = vmatprep.subr.bf16.mxu0 %v2758_v33  ;;  %v2810_v32 = vld [vmem:[%s3114_s22 + $0xc8] sm:$0xff]   ;;  %v2821_v33 = vld [vmem:[%s3114_s22 + $0x20] sm:$0xff]  }
 0x121   : > { %1534 = vmatprep.subr.bf16.mxu1 %v2770_v34  ;;  %v2824_v34 = vld [vmem:[%s3114_s22 + $0x68] sm:$0xff]  }
 0x122   : > { %2443 = vmatmul.mubr.msk.bf16.vlgmr.msra.gmra.mrb[8].mxu0 %vm643_vm1, %v3130_v18 }
 0x123   : > { %2444 = vmatmul.mubr.msk.bf16.vlgmr.msra.gmra.mrb[16].mxu1 %vm643_vm1, %v3130_v18  ;;  %1371 = vmatpush1.bf16.msra.mxu0 %v2756_v35  ;;  %v2811_v35 = vld [vmem:[%s3114_s22 + $0x88] sm:$0xff]  }
 0x124   : > { %1372 = vmatprep.subr.bf16.mxu0 %v2761_v36  ;;  %1402 = vmatprep.mubr.bf16.mxu0 %v2864_v26  ;;  %v2814_v36 = vld [vmem:[%s3114_s22 + $0xd0] sm:$0xff]  }
 0x125   : > { %1535 = vmatpush1.bf16.msra.mxu1 %v2768_v37  ;;  %1566 = vmatprep.mubr.bf16.mxu1 %v2864_v26  ;;  %v2825_v37 = vld [vmem:[%s3114_s22 + $0x28] sm:$0xff]  }
 0x126   : > { %1536 = vmatprep.subr.bf16.mxu1 %v2776_v38  ;;  %v2815_v38 = vld [vmem:[%s3114_s22 + $0x90] sm:$0xff]  }
 0x127   : > { %1373 = vmatpush1.bf16.msra.mxu0 %v2759_v39  ;;  %v2818_v39 = vld [vmem:[%s3114_s22 + $0xd8] sm:$0xff]  }
 0x128   : > { %1374 = vmatprep.subr.bf16.mxu0 %v2764_v40 }
 0x129   : > { %1537 = vmatpush1.bf16.msra.mxu1 %v2774_v41 }
 0x12a   : > { %1538 = vmatprep.subr.bf16.mxu1 %v2782_v42  ;;  %v2819_v42 = vld [vmem:[%s3114_s22 + $0x98] sm:$0xff]  }
 0x12b   : > { %1375 = vmatpush1.bf16.msra.mxu0 %v2762_v43 }
 0x12c   : > { %1376 = vmatprep.subr.bf16.mxu0 %v2767_v44  ;;  %v2822_v44 = vld [vmem:[%s3114_s22 + $0xe0] sm:$0xff]  }
 0x12d   : > { %1539 = vmatpush1.bf16.msra.mxu1 %v2780_v45 }
 0x12e   : > { %1540 = vmatprep.subr.bf16.mxu1 %v2788_v53  ;;  %v2832_v53 = vld [vmem:[%s3114_s22 + $0x78] sm:$0xff]  }
 0x12f   : > { %1377 = vmatpush1.bf16.msra.mxu0 %v2765_v46  ;;  %v2823_v46 = vld [vmem:[%s3114_s22 + $0xa0] sm:$0xff]  }
 0x130   : > { %1575 = vmatprep.subr.bf16.mxu0 %v2773_v47  ;;  %v2826_v47 = vld [vmem:[%s3114_s22 + $0xe8] sm:$0xff]  }
 0x131   : > { %1541 = vmatpush1.bf16.msra.mxu1 %v2786_v54  ;;  %v2833_v54 = vld [vmem:[%s3114_s22 + $0x38] sm:$0xff]  }
 0x132   : > { %2445 = vmatmul.mubr.msk.bf16.vlgmr.msra.gmra.mrb[12].mxu0 %vm643_vm1, %v3130_v18  ;;  %1616 = vmatprep.subr.bf16.mxu1 %v2794_v57  ;;  %v2813_v18 = vld [vmem:[%s3114_s22 + $0x10] sm:$0xff]   ;;  %v2836_v57 = vld [vmem:[%s3114_s22 + $0x140] sm:$0xff]  }
 0x133   : > { %1576 = vmatpush1.bf16.msra.mxu0 %v2771_v48  ;;  %1607 = vmatprep.mubr.bf16.mxu0 %v2864_v26  ;;  %v2827_v48 = vld [vmem:[%s3114_s22 + $0xa8] sm:$0xff]  }
 0x134   : > { %1577 = vmatprep.subr.bf16.mxu0 %v2779_v49  ;;  %v2828_v49 = vld [vmem:[%s3114_s22 + $0x70] sm:$0xff]  }
 0x137   : > { %1578 = vmatpush1.bf16.msra.mxu0 %v2777_v50  ;;  %v2829_v50 = vld [vmem:[%s3114_s22 + $0x30] sm:$0xff]  }
 0x138   : > { %1579 = vmatprep.subr.bf16.mxu0 %v2785_v51  ;;  %v2830_v51 = vld [vmem:[%s3114_s22 + $0xf0] sm:$0xff]  }
 0x13b   : > { %1580 = vmatpush1.bf16.msra.mxu0 %v2783_v52  ;;  %v2831_v52 = vld [vmem:[%s3114_s22 + $0xb0] sm:$0xff]  }
 0x13c   : > { %1581 = vmatprep.subr.bf16.mxu0 %v2791_v55  ;;  %v2834_v55 = vld [vmem:[%s3114_s22 + $0xf8] sm:$0xff]  }
 0x13f   : > { %1582 = vmatpush1.bf16.msra.mxu0 %v2789_v56  ;;  %v2835_v56 = vld [vmem:[%s3114_s22 + $0xb8] sm:$0xff]  }
 0x140   : > { %2556 = vmatprep.subr.bf16.mxu0 %v2804_v58  ;;  %v1659_v58 = vlaneseq }
 0x1e5   : > { %v1038_v59 = vpop.f32.mrb[4].mxu0 }
 0x1e6   : > { %v2680_v60 = vpop.f32.mrb[5].mxu0  ;;  %v1105_v61 = vpop.f32.mrb[12].mxu1 }
 0x1e7   : > { %v1106_v63 = vadd.f32 %v1105_v61, %v1038_v59  ;;  %v1041_v0 = vpop.f32.mrb[6].mxu0  ;;  %v2692_v1 = vpop.f32.mrb[13].mxu1  ;;  %v3245_v59 = vshrl.u32 %v1659_v58, 7 }
 0x1e8   : > { %v2681_v2 = vpop.f32.mrb[7].mxu0  ;;  %v1108_v3 = vpop.f32.mrb[14].mxu1 }
 0x1e9   : > { %v1118_v4 = vadd.f32 %v2418_v62, %v1106_v63  ;;  %v2693_v5 = vpop.f32.mrb[15].mxu1  ;;  %v1661_v60 = vsub.s32 0, %v3245_v59  ;;  %v1669_v61 = vsub.s32 2, %v3245_v59  ;;  %v3252_v62 = vld [vmem:[%s578_s26] sm:$0x3f]  ;;  %v1665_v63 = vsub.s32 1, %v3245_v59 }
 0x1ea   : > { %v1673_v0 = vsub.s32 3, %v3245_v59 }
 0x1eb   : > { %v1119_v7 = vpack.c.bf16 %v1118_v4, %v1118_v4  ;;  %v1662_v1 = vrot.slane %v3252_v62, %v1661_v60  ;;  %v1670_v2 = vrot.slane %v3252_v62, %v1669_v61  ;;  %v1666_v5 = vrot.slane %v3252_v62, %v1665_v63 }
 0x1ed   : > { %2470 = vmatmul.mubr.msk.bf16.vlgmr.msra.gmra.mrb[20].mxu1 %vm643_vm1, %v1119_v7  ;;  %2471 = vmatmul.mubr.msk.bf16.vlgmr.msra.gmra.mrb[16].mxu0 %vm643_vm1, %v1119_v7 }
 0x1ee   : > { %1617 = vmatpush1.bf16.msra.mxu1 %v2792_v6  ;;  %1648 = vmatprep.mubr.bf16.mxu1 %v2864_v26  ;;  %v2817_v26 = vld [vmem:[%s3114_s22 + $0x18] sm:$0xff]   ;;  %v1674_v6 = vrot.slane %v3252_v62, %v1673_v0 }
 0x1ef   : > { %1618 = vmatprep.subr.bf16.mxu1 %v2797_v8  ;;  %2557 = vmatpush3.bf16.msra.mxu0 %v2805_v9 }
 0x1f0   : > { %2558 = vmatprep.subr.bf16.mxu0 %v2808_v10 }
 0x1f2   : > { %1619 = vmatpush1.bf16.msra.mxu1 %v2795_v11 }
 0x1f3   : > { %1620 = vmatprep.subr.bf16.mxu1 %v2800_v12  ;;  %2559 = vmatpush3.bf16.msra.mxu0 %v2809_v13 }
 0x1f4   : > { %2560 = vmatprep.subr.bf16.mxu0 %v2812_v14 }
 0x1f5   : > { %v3204_v20 = vpop.f32.mrb[8].mxu0 }
 0x1f6   : > { %v3206_v21 = vpop.f32.mrb[9].mxu0  ;;  %v3208_v22 = vpop.f32.mrb[16].mxu1  ;;  %1621 = vmatpush1.bf16.msra.mxu1 %v2798_v16 }
 0x1f7   : > { %v1326_v23 = vpop.f32.mrb[10].mxu0  ;;  %v3211_v24 = vpop.f32.mrb[17].mxu1  ;;  %1622 = vmatprep.subr.bf16.mxu1 %v2803_v17  ;;  %2561 = vmatpush3.bf16.msra.mxu0 %v2813_v18 }
 0x1f8   : > { %v1327_v27 = vpop.f32.mrb[11].mxu0  ;;  %v1367_v28 = vpop.f32.mrb[18].mxu1  ;;  %2562 = vmatprep.subr.bf16.mxu0 %v2816_v19 }
 0x1f9   : > { %v1368_v30 = vpop.f32.mrb[19].mxu1  ;;  %v2837_v28 = vld [vmem:[%s3114_s22 + $0x100] sm:$0xff]  }
 0x1fa   : > { %1623 = vmatpush1.bf16.msra.mxu1 %v2801_v15  ;;  %v2838_v30 = vld [vmem:[%s3114_s22 + $0x148] sm:$0xff]  }
 0x1fb   : > { %2578 = vmatprep.subr.bf16.mxu1 %v2806_v25  ;;  %2563 = vmatpush3.bf16.msra.mxu0 %v2817_v26 }
 0x1fc   : > { %2564 = vmatprep.subr.bf16.mxu0 %v2820_v29 }
 0x1fd   : > { %2472 = vmatmul.mubr.msk.bf16.vlgmr.msra.gmra.mrb[24].mxu1 %vm643_vm1, %v1119_v7 }
 0x1fe   : > { %2579 = vmatpush3.bf16.msra.mxu1 %v2807_v31  ;;  %v2839_v31 = vld [vmem:[%s3114_s22 + $0x108] sm:$0xff]  }
 0x1ff   : > { %2580 = vmatprep.subr.bf16.mxu1 %v2810_v32  ;;  %2565 = vmatpush3.bf16.msra.mxu0 %v2821_v33  ;;  %v1681_v32 = vsub.s32 5, %v3245_v59  ;;  %v2840_v33 = vld [vmem:[%s3114_s22 + $0x150] sm:$0xff]  }
 0x200   : > { %2566 = vmatprep.subr.bf16.mxu0 %v2824_v34 }
 0x202   : > { %2581 = vmatpush3.bf16.msra.mxu1 %v2811_v35  ;;  %v1682_v35 = vrot.slane %v3252_v62, %v1681_v32 }
 0x203   : > { %2582 = vmatprep.subr.bf16.mxu1 %v2814_v36  ;;  %2567 = vmatpush3.bf16.msra.mxu0 %v2825_v37  ;;  %v2841_v36 = vld [vmem:[%s3114_s22 + $0x110] sm:$0xff]  }
 0x204   : > { %2568 = vmatprep.subr.bf16.mxu0 %v2828_v49 }
 0x205   : > { %v3226_v40 = vpop.f32.mrb[12].mxu0 }
 0x206   : > { %v3228_v41 = vpop.f32.mrb[13].mxu0  ;;  %2583 = vmatpush3.bf16.msra.mxu1 %v2815_v38 }
 0x207   : > { %v1408_v43 = vpop.f32.mrb[14].mxu0  ;;  %2584 = vmatprep.subr.bf16.mxu1 %v2818_v39  ;;  %2569 = vmatpush3.bf16.msra.mxu0 %v2829_v50  ;;  %v2842_v39 = vld [vmem:[%s3114_s22 + $0x158] sm:$0xff]   ;;  %v1677_v50 = vsub.s32 4, %v3245_v59 }
 0x208   : > { %v1409_v45 = vpop.f32.mrb[15].mxu0  ;;  %2570 = vmatprep.subr.bf16.mxu0 %v2832_v53  ;;  %v2848_v53 = vld [vmem:[%s3114_s22 + $0x170] sm:$0xff]  }
 0x20a   : > { %2585 = vmatpush3.bf16.msra.mxu1 %v2819_v42 }
 0x20b   : > { %2586 = vmatprep.subr.bf16.mxu1 %v2822_v44  ;;  %2571 = vmatpush3.bf16.msra.mxu0 %v2833_v54  ;;  %v2849_v54 = vld [vmem:[%s3114_s22 + $0x130] sm:$0xff]  }
 0x20c   : > { %2600 = vmatprep.subr.bf16.mxu0 %v2836_v57  ;;  %v2851_v57 = vld [vmem:[%s3114_s22 + $0x138] sm:$0xff]  }
 0x20e   : > { %2587 = vmatpush3.bf16.msra.mxu1 %v2823_v46  ;;  %v2843_v46 = vld [vmem:[%s3114_s22 + $0x118] sm:$0xff]  }
 0x20f   : > { %2588 = vmatprep.subr.bf16.mxu1 %v2826_v47  ;;  %v2844_v47 = vld [vmem:[%s3114_s22 + $0x160] sm:$0xff]  }
 0x212   : > { %2589 = vmatpush3.bf16.msra.mxu1 %v2827_v48 }
 0x213   : > { %2590 = vmatprep.subr.bf16.mxu1 %v2830_v51  ;;  %v2847_v51 = vld [vmem:[%s3114_s22 + $0x128] sm:$0xff]  }
 0x216   : > { %2591 = vmatpush3.bf16.msra.mxu1 %v2831_v52  ;;  %v1678_v52 = vrot.slane %v3252_v62, %v1677_v50  ;;  %v2473_v62 = vld [vmem:[%s586_s18] ss:$0 sm:$0xff] }
 0x217   : > { %2592 = vmatprep.subr.bf16.mxu1 %v2834_v55 }
 0x21a   : > { %2593 = vmatpush3.bf16.msra.mxu1 %v2835_v56  ;;  %v2850_v56 = vld [vmem:[%s3114_s22 + $0x178] sm:$0xff]  }
 0x2c0   : > { %v1568_v3 = vpop.f32.mrb[20].mxu1  ;;  %v1609_v4 = vpop.f32.mrb[16].mxu0 }
 0x2c1   : > { %v1569_v7 = vadd.f32 %v1568_v3, %v3204_v20  ;;  %v1610_v8 = vadd.f32 %v1609_v4, %v3208_v22  ;;  %v1570_v9 = vpop.f32.mrb[21].mxu1  ;;  %v1611_v10 = vpop.f32.mrb[17].mxu0 }
 0x2c2   : > { %v1571_v11 = vadd.f32 %v1570_v9, %v3206_v21  ;;  %v1612_v12 = vadd.f32 %v1611_v10, %v3211_v24  ;;  %v1572_v13 = vpop.f32.mrb[22].mxu1  ;;  %v1613_v14 = vpop.f32.mrb[18].mxu0 }
 0x2c3   : > { %v1689_v16 = vadd.f32 %v1662_v1, %v1569_v7  ;;  %v1691_v17 = vadd.f32 %v1670_v2, %v1610_v8  ;;  %v1573_v18 = vpop.f32.mrb[23].mxu1  ;;  %v1614_v19 = vpop.f32.mrb[19].mxu0 }
 0x2c4   : > { %v1690_v15 = vadd.f32 %v1666_v5, %v1571_v11  ;;  %v1692_v23 = vadd.f32 %v1674_v6, %v1612_v12 }
 0x2c5   : > { %v1695_v20 = vmax.f32 %v1689_v16, 0.0  ;;  %v1697_v25 = vmax.f32 %v1691_v17, 0.0 }
 0x2c6   : > { %v1696_v22 = vmax.f32 %v1690_v15, 0.0  ;;  %v1698_v26 = vmax.f32 %v1692_v23, 0.0 }
 0x2c7   : > { %v1701_v24 = vpack.c.bf16 %v1695_v20, %v1695_v20  ;;  %v1703_v29 = vpack.c.bf16 %v1697_v25, %v1697_v25 }
 0x2c8   : > { %v1702_v27 = vpack.c.bf16 %v1696_v22, %v1696_v22  ;;  %v1704_v21 = vpack.c.bf16 %v1698_v26, %v1698_v26 }
 0x2ca   : > { %2130 = vmatprep.mubr.bf16.mxu0 %v1702_v27  ;;  %2170 = vmatprep.mubr.bf16.mxu1 %v1704_v21 }
 0x2cb   : > { %2131 = vmatmul.mubr.bf16.vlgmr.msra.gmra.mrb[20].mxu0 %v1701_v24  ;;  %2171 = vmatmul.mubr.bf16.vlgmr.msra.gmra.mrb[28].mxu1 %v1703_v29 }
 0x2cc   : > { %2601 = vmatpush3.bf16.msra.mxu0 %v2837_v28 }
 0x2cd   : > { %2602 = vmatprep.subr.bf16.mxu0 %v2838_v30 }
 0x2d0   : > { %v1650_v34 = vpop.f32.mrb[24].mxu1  ;;  %2603 = vmatpush3.bf16.msra.mxu0 %v2839_v31 }
 0x2d1   : > { %v1651_v37 = vadd.f32 %v1650_v34, %v3226_v40  ;;  %v1652_v38 = vpop.f32.mrb[25].mxu1  ;;  %2604 = vmatprep.subr.bf16.mxu0 %v2840_v33  ;;  %v2845_v40 = vld [vmem:[%s3114_s22 + $0x120] sm:$0xff]  }
 0x2d2   : > { %v1653_v42 = vadd.f32 %v1652_v38, %v3228_v41  ;;  %v1654_v43 = vpop.f32.mrb[26].mxu1  ;;  %v2846_v41 = vld [vmem:[%s3114_s22 + $0x168] sm:$0xff]   ;;  %s2365_s22 = sshll.u32 %s3061_s15, 2 }
 0x2d3   : > { %v1655_v44 = vpop.f32.mrb[27].mxu1  ;;  %v1693_v55 = vadd.f32 %v1678_v52, %v1651_v37  ;;  %s590_s21 = scalar_lea.vmem %s3310_s14, %s2365_s22 }
 0x2d4   : > { %v1694_v45 = vadd.f32 %v1682_v35, %v1653_v42  ;;  %2605 = vmatpush3.bf16.msra.mxu0 %v2841_v36 }
 0x2d5   : > { %2606 = vmatprep.subr.bf16.mxu0 %v2842_v39  ;;  %v1699_v58 = vmax.f32 %v1693_v55, 0.0 }
 0x2d6   : > { %v1700_v48 = vmax.f32 %v1694_v45, 0.0 }
 0x2d7   : > { %v1705_v59 = vpack.c.bf16 %v1699_v58, %v1699_v58 }
 0x2d8   : > { %v1706_v49 = vpack.c.bf16 %v1700_v48, %v1700_v48  ;;  %2607 = vmatpush3.bf16.msra.mxu0 %v2843_v46 }
 0x2d9   : > { %2608 = vmatprep.subr.bf16.mxu0 %v2844_v47 }
 0x2da   : > { %2210 = vmatprep.mubr.bf16.mxu0 %v1706_v49 }
 0x2dc   : > { %2609 = vmatpush3.bf16.msra.mxu0 %v2845_v40 }
 0x2dd   : > { %2610 = vmatprep.subr.bf16.mxu0 %v2846_v41 }
 0x2e0   : > { %2611 = vmatpush3.bf16.msra.mxu0 %v2847_v51 }
 0x2e1   : > { %2612 = vmatprep.subr.bf16.mxu0 %v2848_v53 }
 0x2e4   : > { %2613 = vmatpush3.bf16.msra.mxu0 %v2849_v54 }
 0x2e5   : > { %2614 = vmatprep.subr.bf16.mxu0 %v2850_v56 }
 0x2e8   : > { %2615 = vmatpush3.bf16.msra.mxu0 %v2851_v57 }
 0x2eb   : > { %2211 = vmatmul.mubr.bf16.vlgmr.msra.gmra.mrb[24].mxu0 %v1705_v59 }
 0x39e   : > { %v2572_v60 = vpop.f32.mrb[20].mxu0  ;;  %v2594_v61 = vpop.f32.mrb[28].mxu1 }
 0x39f   : > { %v2573_v63 = vpop.f32.mrb[21].mxu0  ;;  %v2595_v0 = vpop.f32.mrb[29].mxu1 }
 0x3a0   : > { %v2574_v1 = vadd.f32 %v2573_v63, %v2572_v60  ;;  %v2596_v2 = vadd.f32 %v2595_v0, %v2594_v61  ;;  %v2575_v3 = vpop.f32.mrb[22].mxu0  ;;  %v2597_v4 = vpop.f32.mrb[30].mxu1 }
 0x3a1   : > { %v2576_v5 = vpop.f32.mrb[23].mxu0  ;;  %v2598_v6 = vpop.f32.mrb[31].mxu1 }
 0x3a2   : > { %v2133_v7 = vadd.f32 %v2574_v1, %v2473_v62 }
 0x3a4   : > { %v2173_v8 = vadd.f32 %v2596_v2, %v2133_v7 }
 0x3be   : > { %v2616_v9 = vpop.f32.mrb[24].mxu0 }
 0x3bf   : > { %v2617_v10 = vpop.f32.mrb[25].mxu0 }
 0x3c0   : > { %v2618_v11 = vadd.f32 %v2617_v10, %v2616_v9  ;;  %v2619_v12 = vpop.f32.mrb[26].mxu0 }
 0x3c1   : > { %v2620_v13 = vpop.f32.mrb[27].mxu0 }
 0x3c2   : > { %v2213_v14 = vadd.f32 %v2618_v11, %v2173_v8 }
 0x3c4   : > { %v2218_v16 = vmax.f32 %v2213_v14, 0.0 }
 0x3c6   : > { %v2219_v17 = vpack.c.bf16 %v2218_v16, %v2218_v16 }
 0x3c8   : > { %2221 = vst.msk [vmem:[%s590_s21] sm:$0xf] %vm2220_vm2, %v2219_v17 }
 0x3c9 PF: > { %s24_s29 = sadd.s32 1, %s2860_s29  }
 0x3ca   : > { %p21_p8 = scmp.ge.s32.totalorder %s24_s29, 6  }
 0x3cc   :  { %23 = sbr.rel (!%p21_p8) target bundleno = 1 (0x1), region = 133 }

</bundles_post_ra>
